<compile_context>
chip_gen: v6e
topology: v6e:2x2x1
jax: 0.10.0
libtpu: 0.0.40
codegen_flags: <defaults>
</compile_context>

<pallas_src>
import functools

import jax
import jax.numpy as jnp
from jax.experimental import pallas as pl
from jax.experimental.pallas import tpu as pltpu  # noqa: F401  (not needed at this size)

# ---- module hyper-parameters (small, consistent with the nn.Module) ----
DIM = 32            # embedding dim
DEPTH = 2           # number of transformer layers
HEADS = 4           # attention heads
DIM_HEAD = 16       # per-head dim
INNER = HEADS * DIM_HEAD     # 64
MLP_DIM = 64        # hidden dim of the feed-forward block
SCALE = DIM_HEAD ** (-0.5)
LN_EPS = 1e-5

B = 2               # batch
N = 8               # sequence length


def _layernorm(x, gamma, beta):
    """LayerNorm over the last dim (biased variance, eps=1e-5, affine)."""
    mean = jnp.mean(x, axis=-1, keepdims=True)
    var = jnp.mean(jnp.square(x - mean), axis=-1, keepdims=True)
    return (x - mean) * jax.lax.rsqrt(var + LN_EPS) * gamma + beta


def _erf(x):
    """erf via Abramowitz & Stegun 7.1.26 (|error| <= 1.5e-7); lax.erf has no Mosaic lowering."""
    ax = jnp.abs(x)
    t = 1.0 / (1.0 + 0.3275911 * ax)
    poly = ((((1.061405429 * t - 1.453152027) * t + 1.421413741) * t
             - 0.284496736) * t + 0.254829592) * t
    y = 1.0 - poly * jnp.exp(-ax * ax)
    return jnp.where(x < 0.0, -y, y)


def _gelu_exact(x):
    """Exact GELU (nn.GELU default): 0.5*x*(1+erf(x/sqrt(2)))."""
    return 0.5 * x * (1.0 + _erf(x * 0.7071067811865476))


def _transformer_kernel(x_ref,
                        attn_g_ref, attn_b_ref, wq_ref, wk_ref, wv_ref,
                        wout_ref, bout_ref,
                        ff_g_ref, ff_b_ref, w1_ref, b1_ref, w2_ref, b2_ref,
                        fin_g_ref, fin_b_ref,
                        o_ref,
                        *, depth, heads, dim_head, seq_len):
    """Whole Transformer forward for all T = B*N tokens in one grid-less invocation.

    x_ref   : (T, D) f32             tokens (batch+sequence flattened)
    attn_*  : (depth, 1, D) f32      attention LayerNorm gamma/beta
    wq/wk/wv: (depth, D, inner) bf16 q/k/v projection weights (transposed; scale folded into wq)
    wout_ref: (depth, heads, dim_head, D) bf16   output projection, stacked per head
    bout_ref: (depth, 1, D) f32      output-projection bias
    ff_*    : (depth, 1, D) f32      MLP LayerNorm gamma/beta
    w1_ref  : (depth, D, mlp) bf16   b1_ref: (depth, 1, mlp) f32
    w2_ref  : (depth, mlp, D) bf16   b2_ref: (depth, 1, D) f32
    fin_*   : (1, D) f32             final LayerNorm gamma/beta
    o_ref   : (T, D) f32
    """
    x = x_ref[...]                       # (T, D) f32
    T = x.shape[0]

    # Block-diagonal additive mask built in-kernel (no (T,T) HBM input / DMA).
    # A token attends only within its own sequence; the diagonal is always unmasked,
    # so row maxima stay finite (guard needed only if fully-masked rows ever appear).
    row = jax.lax.broadcasted_iota(jnp.int32, (T, T), 0).astype(jnp.float32)
    col = jax.lax.broadcasted_iota(jnp.int32, (T, T), 1).astype(jnp.float32)
    inv_n = 1.0 / float(seq_len)
    neg_mask = jnp.where(jnp.floor(row * inv_n) == jnp.floor(col * inv_n), 0.0, -1e30)

    for l in range(depth):               # static unroll over layers (depth=2)
        # ---- multi-head self-attention (pre-LN) + residual ----
        xn = _layernorm(x, attn_g_ref[l], attn_b_ref[l])
        xn_bf = xn.astype(jnp.bfloat16)
        # Three (D, inner) matmuls: each of q/k/v lives in a single 64-lane vreg group,
        # so per-head 16-lane slices never cross a vreg boundary.  bf16 operands, f32 acc.
        q = jnp.dot(xn_bf, wq_ref[l], preferred_element_type=jnp.float32).astype(jnp.bfloat16)
        k = jnp.dot(xn_bf, wk_ref[l], preferred_element_type=jnp.float32).astype(jnp.bfloat16)
        v = jnp.dot(xn_bf, wv_ref[l], preferred_element_type=jnp.float32).astype(jnp.bfloat16)

        # Fold residual + out-projection bias into the head accumulator init.
        acc = x + bout_ref[l]                                             # (T, D) f32
        for h in range(heads):           # static unroll over heads (heads=4)
            lo = h * dim_head
            q_h = q[:, lo:lo + dim_head]                                  # (T, d) bf16; scale folded
            k_h = k[:, lo:lo + dim_head]                                  # (T, d) bf16
            v_h = v[:, lo:lo + dim_head]                                  # (T, d) bf16

            # q @ k^T over all tokens at once; cross-sequence pairs masked to -1e30.
            dots = jax.lax.dot_general(q_h, k_h, (((1,), (1,)), ((), ())),
                                       preferred_element_type=jnp.float32) + neg_mask
            m = jnp.max(dots, axis=-1, keepdims=True)
            p = jnp.exp(dots - m)
            attn = p * pl.reciprocal(jnp.sum(p, axis=-1, keepdims=True), approx=True)
            # dropout(p=0.0) is identity
            ctx = jnp.dot(attn.astype(jnp.bfloat16), v_h,
                          preferred_element_type=jnp.float32)             # (T, d) f32
            # Output projection folded into the head loop; per-head weight is a free
            # leading-dim view (no sublane/lane slicing of the weight).
            acc = acc + jnp.dot(ctx.astype(jnp.bfloat16), wout_ref[l, h],
                                preferred_element_type=jnp.float32)
        x = acc

        # ---- feed-forward (pre-LN, exact GELU) + residual ----
        xn = _layernorm(x, ff_g_ref[l], ff_b_ref[l])
        h1 = jnp.dot(xn.astype(jnp.bfloat16), w1_ref[l],
                     preferred_element_type=jnp.float32) + b1_ref[l]
        h1 = _gelu_exact(h1)
        x = x + jnp.dot(h1.astype(jnp.bfloat16), w2_ref[l],
                        preferred_element_type=jnp.float32) + b2_ref[l]

    # ---- final LayerNorm ----
    o_ref[...] = _layernorm(x, fin_g_ref[...], fin_b_ref[...])


def prepare_params(params):
    """One-time weight preprocessing (stack / transpose / scale-fold / bf16 cast).

    Called ONCE outside the hot path; the returned arrays are reused by every
    transformer_forward() call so none of this is re-emitted per forward.
    PyTorch conventions on input: Linear weight is (out_features, in_features).
    """
    layers = params["layers"]
    depth = len(layers)

    def stack(name):
        return jnp.stack([jnp.asarray(lyr[name], jnp.float32) for lyr in layers])

    w_qkv = stack("w_qkv")                           # (depth, 3*inner, D)
    wq, wk, wv = jnp.split(w_qkv, 3, axis=1)         # each (depth, inner, D)
    w_out_t = jnp.transpose(stack("w_out"), (0, 2, 1))  # (depth, inner, D), head-major rows

    prepped = dict(
        attn_g=stack("attn_ln_g").reshape(depth, 1, -1),
        attn_b=stack("attn_ln_b").reshape(depth, 1, -1),
        # Softmax scale folded into the q weight (exact: SCALE is a power of two here).
        wq=(jnp.transpose(wq, (0, 2, 1)) * SCALE).astype(jnp.bfloat16),   # (depth, D, inner)
        wk=jnp.transpose(wk, (0, 2, 1)).astype(jnp.bfloat16),             # (depth, D, inner)
        wv=jnp.transpose(wv, (0, 2, 1)).astype(jnp.bfloat16),             # (depth, D, inner)
        wout=w_out_t.reshape(depth, HEADS, DIM_HEAD, -1).astype(jnp.bfloat16),
        bout=stack("b_out").reshape(depth, 1, -1),
        ff_g=stack("ff_ln_g").reshape(depth, 1, -1),
        ff_b=stack("ff_ln_b").reshape(depth, 1, -1),
        w1=jnp.transpose(stack("w1"), (0, 2, 1)).astype(jnp.bfloat16),    # (depth, D, mlp)
        b1=stack("b1").reshape(depth, 1, -1),
        w2=jnp.transpose(stack("w2"), (0, 2, 1)).astype(jnp.bfloat16),    # (depth, mlp, D)
        b2=stack("b2").reshape(depth, 1, -1),
        fin_g=jnp.asarray(params["final_g"], jnp.float32).reshape(1, -1),
        fin_b=jnp.asarray(params["final_b"], jnp.float32).reshape(1, -1),
    )
    return jax.block_until_ready(prepped)


@jax.jit
def transformer_forward(x, p):
    """x: (B, N, D) f32; p: output of prepare_params()."""
    Bn, Nn, Dn = x.shape
    T = Bn * Nn
    depth = p["wq"].shape[0]
    heads = p["wout"].shape[1]
    dim_head = p["wout"].shape[2]
    inner = heads * dim_head
    mlp = p["w1"].shape[-1]

    # Advisory cost estimate so XLA can overlap surrounding ops with this short call.
    flops = depth * (3 * 2 * T * Dn * inner                 # q/k/v projections
                     + heads * 2 * (2 * T * T * dim_head)   # dots + attn@v
                     + 2 * T * inner * Dn                   # output projection
                     + 2 * (2 * T * Dn * mlp))              # MLP
    transcendentals = depth * (heads * T * T + T * mlp)     # softmax exp + gelu exp
    param_bytes = sum(a.size * a.dtype.itemsize for a in jax.tree_util.tree_leaves(p))
    bytes_accessed = param_bytes + 2 * T * Dn * 4

    kernel = functools.partial(_transformer_kernel, depth=depth, heads=heads,
                               dim_head=dim_head, seq_len=Nn)

    # No grid / BlockSpecs / scalar prefetch: the whole problem (<100 KB) fits in VMEM on
    # v5e/v6e/v7x for a single invocation; no pipelining or megacore sharding is worthwhile.
    y2d = pl.pallas_call(
        kernel,
        out_shape=jax.ShapeDtypeStruct((T, Dn), jnp.float32),
        cost_estimate=pl.CostEstimate(flops=flops, transcendentals=transcendentals,
                                      bytes_accessed=bytes_accessed),
    )(x.reshape(T, Dn).astype(jnp.float32),
      p["attn_g"], p["attn_b"], p["wq"], p["wk"], p["wv"], p["wout"], p["bout"],
      p["ff_g"], p["ff_b"], p["w1"], p["b1"], p["w2"], p["b2"],
      p["fin_g"], p["fin_b"])
    return y2d.reshape(Bn, Nn, Dn)


def transformer_reference(x, params):
    """Pure-JAX f32 reference mirroring the PyTorch Transformer.forward."""
    def layernorm(t, g, b):
        mean = jnp.mean(t, axis=-1, keepdims=True)
        var = jnp.mean((t - mean) ** 2, axis=-1, keepdims=True)
        return (t - mean) / jnp.sqrt(var + LN_EPS) * g + b

    def to_heads(t):  # b n (h d) -> b h n d
        Bn, Nn, _ = t.shape
        return t.reshape(Bn, Nn, HEADS, DIM_HEAD).transpose(0, 2, 1, 3)

    for lyr in params["layers"]:
        # Attention block
        xn = layernorm(x, lyr["attn_ln_g"], lyr["attn_ln_b"])
        qkv = xn @ lyr["w_qkv"].T
        q, k, v = map(to_heads, jnp.split(qkv, 3, axis=-1))
        dots = jnp.einsum("bhnd,bhmd->bhnm", q, k) * SCALE
        attn = jax.nn.softmax(dots, axis=-1)
        out = jnp.einsum("bhnm,bhmd->bhnd", attn, v)
        out = out.transpose(0, 2, 1, 3).reshape(x.shape[0], x.shape[1], INNER)
        x = x + out @ lyr["w_out"].T + lyr["b_out"]
        # FeedForward block (exact GELU, matching nn.GELU default)
        xn = layernorm(x, lyr["ff_ln_g"], lyr["ff_ln_b"])
        h = jax.nn.gelu(xn @ lyr["w1"].T + lyr["b1"], approximate=False)
        x = x + h @ lyr["w2"].T + lyr["b2"]
    return layernorm(x, params["final_g"], params["final_b"])


if __name__ == "__main__":
    key = jax.random.PRNGKey(0)
    key, kx = jax.random.split(key)
    x = jax.random.normal(kx, (B, N, DIM), dtype=jnp.float32)

    # Deterministic synthetic parameters (PyTorch weight conventions).
    layers = []
    for _ in range(DEPTH):
        key, *ks = jax.random.split(key, 12)
        layers.append(dict(
            attn_ln_g=1.0 + 0.02 * jax.random.normal(ks[0], (DIM,), jnp.float32),
            attn_ln_b=0.02 * jax.random.normal(ks[1], (DIM,), jnp.float32),
            w_qkv=0.05 * jax.random.normal(ks[2], (3 * INNER, DIM), jnp.float32),
            w_out=0.05 * jax.random.normal(ks[3], (DIM, INNER), jnp.float32),
            b_out=0.02 * jax.random.normal(ks[4], (DIM,), jnp.float32),
            ff_ln_g=1.0 + 0.02 * jax.random.normal(ks[5], (DIM,), jnp.float32),
            ff_ln_b=0.02 * jax.random.normal(ks[6], (DIM,), jnp.float32),
            w1=0.05 * jax.random.normal(ks[7], (MLP_DIM, DIM), jnp.float32),
            b1=0.02 * jax.random.normal(ks[8], (MLP_DIM,), jnp.float32),
            w2=0.05 * jax.random.normal(ks[9], (DIM, MLP_DIM), jnp.float32),
            b2=0.02 * jax.random.normal(ks[10], (DIM,), jnp.float32),
        ))
    key, kg, kb = jax.random.split(key, 3)
    params = dict(
        layers=layers,
        final_g=1.0 + 0.02 * jax.random.normal(kg, (DIM,), jnp.float32),
        final_b=0.02 * jax.random.normal(kb, (DIM,), jnp.float32),
    )

    # One-time preprocessing (cached across calls), then the jitted forward.
    prepped = prepare_params(params)
    y = transformer_forward(x, prepped)
    y = jax.block_until_ready(y)

    y_ref = transformer_reference(x, params)
    assert y.shape == (B, N, DIM)
    # Tolerance reflects bf16 MXU operands (f32 accumulation; ~1e-3-level relative error
    # per matmul), pl.reciprocal(approx=True) in the softmax (~2^-12), and the in-kernel
    # erf polynomial (<=1.5e-7).  Observed error vs the f32 reference is a few 1e-3.
    assert jnp.allclose(y, y_ref, atol=2e-2, rtol=2e-2), "mismatch vs reference"

    print("KERNEL_OK")
</pallas_src>

<mosaic_0001>
module attributes {stable_mosaic.version = 11 : i64} {
  func.func @_transformer_kernel(%arg0: memref<16x32xf32, #tpu.memory_space<vmem>>, %arg1: memref<2x1x32xf32, #tpu.memory_space<vmem>>, %arg2: memref<2x1x32xf32, #tpu.memory_space<vmem>>, %arg3: memref<2x32x64xbf16, #tpu.memory_space<vmem>>, %arg4: memref<2x32x64xbf16, #tpu.memory_space<vmem>>, %arg5: memref<2x32x64xbf16, #tpu.memory_space<vmem>>, %arg6: memref<2x4x16x32xbf16, #tpu.memory_space<vmem>>, %arg7: memref<2x1x32xf32, #tpu.memory_space<vmem>>, %arg8: memref<2x1x32xf32, #tpu.memory_space<vmem>>, %arg9: memref<2x1x32xf32, #tpu.memory_space<vmem>>, %arg10: memref<2x32x64xbf16, #tpu.memory_space<vmem>>, %arg11: memref<2x1x64xf32, #tpu.memory_space<vmem>>, %arg12: memref<2x64x32xbf16, #tpu.memory_space<vmem>>, %arg13: memref<2x1x32xf32, #tpu.memory_space<vmem>>, %arg14: memref<1x32xf32, #tpu.memory_space<vmem>>, %arg15: memref<1x32xf32, #tpu.memory_space<vmem>>, %arg16: memref<16x32xf32, #tpu.memory_space<vmem>>) attributes {dimension_semantics = [], scalar_prefetch = 0 : i64, scratch_operands = 0 : i64, tpu.core_type = #tpu.core_type<tc>} {
    %c0 = arith.constant 0 : index
    %c0_0 = arith.constant 0 : index
    %0 = vector.load %arg0[%c0, %c0_0] : memref<16x32xf32, #tpu.memory_space<vmem>>, vector<16x32xf32>
    %1 = tpu.iota {dimensions = array<i32: 0>} : vector<16x16xi32>
    %2 = arith.sitofp %1 : vector<16x16xi32> to vector<16x16xf32>
    %3 = tpu.iota {dimensions = array<i32: 1>} : vector<16x16xi32>
    %4 = arith.sitofp %3 : vector<16x16xi32> to vector<16x16xf32>
    %cst = arith.constant 1.250000e-01 : f32
    %5 = vector.broadcast %cst : f32 to vector<16x16xf32>
    %6 = arith.mulf %2, %5 : vector<16x16xf32>
    %7 = math.floor %6 : vector<16x16xf32>
    %cst_1 = arith.constant 1.250000e-01 : f32
    %8 = vector.broadcast %cst_1 : f32 to vector<16x16xf32>
    %9 = arith.mulf %4, %8 : vector<16x16xf32>
    %10 = math.floor %9 : vector<16x16xf32>
    %11 = arith.cmpf oeq, %7, %10 : vector<16x16xf32>
    %cst_2 = arith.constant 0.000000e+00 : f32
    %cst_3 = arith.constant -1.000000e+30 : f32
    %12 = vector.broadcast %cst_2 : f32 to vector<16x16xf32>
    %13 = vector.broadcast %cst_3 : f32 to vector<16x16xf32>
    %14 = arith.select %11, %12, %13 : vector<16x16xi1>, vector<16x16xf32>
    %c0_4 = arith.constant 0 : index
    %c0_5 = arith.constant 0 : index
    %c0_6 = arith.constant 0 : index
    %15 = vector.load %arg1[%c0_4, %c0_5, %c0_6] : memref<2x1x32xf32, #tpu.memory_space<vmem>>, vector<1x1x32xf32>
    %16 = vector.shape_cast %15 : vector<1x1x32xf32> to vector<1x32xf32>
    %c0_7 = arith.constant 0 : index
    %c0_8 = arith.constant 0 : index
    %c0_9 = arith.constant 0 : index
    %17 = vector.load %arg2[%c0_7, %c0_8, %c0_9] : memref<2x1x32xf32, #tpu.memory_space<vmem>>, vector<1x1x32xf32>
    %18 = vector.shape_cast %17 : vector<1x1x32xf32> to vector<1x32xf32>
    %cst_10 = arith.constant dense<0.000000e+00> : vector<16xf32>
    %19 = vector.multi_reduction <add>, %0, %cst_10 [1] : vector<16x32xf32> to vector<16xf32>
    %20 = vector.shape_cast %19 : vector<16xf32> to vector<16x1xf32>
    %cst_11 = arith.constant 3.200000e+01 : f32
    %21 = vector.broadcast %cst_11 : f32 to vector<16x1xf32>
    %22 = arith.divf %20, %21 : vector<16x1xf32>
    %23 = vector.broadcast %22 : vector<16x1xf32> to vector<16x32xf32>
    %24 = arith.subf %0, %23 : vector<16x32xf32>
    %25 = arith.mulf %24, %24 : vector<16x32xf32>
    %cst_12 = arith.constant dense<0.000000e+00> : vector<16xf32>
    %26 = vector.multi_reduction <add>, %25, %cst_12 [1] : vector<16x32xf32> to vector<16xf32>
    %27 = vector.shape_cast %26 : vector<16xf32> to vector<16x1xf32>
    %cst_13 = arith.constant 3.200000e+01 : f32
    %28 = vector.broadcast %cst_13 : f32 to vector<16x1xf32>
    %29 = arith.divf %27, %28 : vector<16x1xf32>
    %30 = vector.broadcast %22 : vector<16x1xf32> to vector<16x32xf32>
    %31 = arith.subf %0, %30 : vector<16x32xf32>
    %cst_14 = arith.constant 9.99999974E-6 : f32
    %32 = vector.broadcast %cst_14 : f32 to vector<16x1xf32>
    %33 = arith.addf %29, %32 : vector<16x1xf32>
    %34 = math.rsqrt %33 : vector<16x1xf32>
    %35 = vector.broadcast %34 : vector<16x1xf32> to vector<16x32xf32>
    %36 = arith.mulf %31, %35 : vector<16x32xf32>
    %37 = vector.broadcast %16 : vector<1x32xf32> to vector<16x32xf32>
    %38 = arith.mulf %36, %37 : vector<16x32xf32>
    %39 = vector.broadcast %18 : vector<1x32xf32> to vector<16x32xf32>
    %40 = arith.addf %38, %39 : vector<16x32xf32>
    %41 = arith.truncf %40 : vector<16x32xf32> to vector<16x32xbf16>
    %c0_15 = arith.constant 0 : index
    %c0_16 = arith.constant 0 : index
    %c0_17 = arith.constant 0 : index
    %42 = vector.load %arg3[%c0_15, %c0_16, %c0_17] : memref<2x32x64xbf16, #tpu.memory_space<vmem>>, vector<1x32x64xbf16>
    %43 = vector.shape_cast %42 : vector<1x32x64xbf16> to vector<32x64xbf16>
    %cst_18 = arith.constant dense<0.000000e+00> : vector<16x64xf32>
    %44 = tpu.matmul %41, %43, %cst_18 {dimension_numbers = #tpu.dot_dimension_numbers<[1], [0], [0], [1], [0, 0, 1, 1], [], []>} : vector<16x32xbf16>, vector<32x64xbf16>, vector<16x64xf32> -> vector<16x64xf32>
    %45 = arith.truncf %44 : vector<16x64xf32> to vector<16x64xbf16>
    %c0_19 = arith.constant 0 : index
    %c0_20 = arith.constant 0 : index
    %c0_21 = arith.constant 0 : index
    %46 = vector.load %arg4[%c0_19, %c0_20, %c0_21] : memref<2x32x64xbf16, #tpu.memory_space<vmem>>, vector<1x32x64xbf16>
    %47 = vector.shape_cast %46 : vector<1x32x64xbf16> to vector<32x64xbf16>
    %cst_22 = arith.constant dense<0.000000e+00> : vector<16x64xf32>
    %48 = tpu.matmul %41, %47, %cst_22 {dimension_numbers = #tpu.dot_dimension_numbers<[1], [0], [0], [1], [0, 0, 1, 1], [], []>} : vector<16x32xbf16>, vector<32x64xbf16>, vector<16x64xf32> -> vector<16x64xf32>
    %49 = arith.truncf %48 : vector<16x64xf32> to vector<16x64xbf16>
    %c0_23 = arith.constant 0 : index
    %c0_24 = arith.constant 0 : index
    %c0_25 = arith.constant 0 : index
    %50 = vector.load %arg5[%c0_23, %c0_24, %c0_25] : memref<2x32x64xbf16, #tpu.memory_space<vmem>>, vector<1x32x64xbf16>
    %51 = vector.shape_cast %50 : vector<1x32x64xbf16> to vector<32x64xbf16>
    %cst_26 = arith.constant dense<0.000000e+00> : vector<16x64xf32>
    %52 = tpu.matmul %41, %51, %cst_26 {dimension_numbers = #tpu.dot_dimension_numbers<[1], [0], [0], [1], [0, 0, 1, 1], [], []>} : vector<16x32xbf16>, vector<32x64xbf16>, vector<16x64xf32> -> vector<16x64xf32>
    %53 = arith.truncf %52 : vector<16x64xf32> to vector<16x64xbf16>
    %c0_27 = arith.constant 0 : index
    %c0_28 = arith.constant 0 : index
    %c0_29 = arith.constant 0 : index
    %54 = vector.load %arg7[%c0_27, %c0_28, %c0_29] : memref<2x1x32xf32, #tpu.memory_space<vmem>>, vector<1x1x32xf32>
    %55 = vector.shape_cast %54 : vector<1x1x32xf32> to vector<1x32xf32>
    %56 = vector.broadcast %55 : vector<1x32xf32> to vector<16x32xf32>
    %57 = arith.addf %0, %56 : vector<16x32xf32>
    %58 = vector.extract_strided_slice %45 {offsets = [0, 0], sizes = [16, 16], strides = [1, 1]} : vector<16x64xbf16> to vector<16x16xbf16>
    %59 = vector.extract_strided_slice %49 {offsets = [0, 0], sizes = [16, 16], strides = [1, 1]} : vector<16x64xbf16> to vector<16x16xbf16>
    %60 = vector.extract_strided_slice %53 {offsets = [0, 0], sizes = [16, 16], strides = [1, 1]} : vector<16x64xbf16> to vector<16x16xbf16>
    %cst_30 = arith.constant dense<0.000000e+00> : vector<16x16xf32>
    %61 = tpu.matmul %58, %59, %cst_30 {dimension_numbers = #tpu.dot_dimension_numbers<[1], [1], [0], [0], [0, 0, 1, 0], [], []>} : vector<16x16xbf16>, vector<16x16xbf16>, vector<16x16xf32> -> vector<16x16xf32>
    %62 = arith.addf %61, %14 : vector<16x16xf32>
    %cst_31 = arith.constant dense<0xFF800000> : vector<16xf32>
    %63 = vector.multi_reduction <maximumf>, %62, %cst_31 [1] : vector<16x16xf32> to vector<16xf32>
    %64 = vector.shape_cast %63 : vector<16xf32> to vector<16x1xf32>
    %65 = vector.broadcast %64 : vector<16x1xf32> to vector<16x16xf32>
    %66 = arith.subf %62, %65 : vector<16x16xf32>
    %67 = math.exp %66 : vector<16x16xf32>
    %cst_32 = arith.constant dense<0.000000e+00> : vector<16xf32>
    %68 = vector.multi_reduction <add>, %67, %cst_32 [1] : vector<16x16xf32> to vector<16xf32>
    %69 = vector.shape_cast %68 : vector<16xf32> to vector<16x1xf32>
    %70 = tpu.reciprocal %69 {approx = true} : vector<16x1xf32> -> vector<16x1xf32>
    %71 = vector.broadcast %70 : vector<16x1xf32> to vector<16x16xf32>
    %72 = arith.mulf %67, %71 : vector<16x16xf32>
    %73 = arith.truncf %72 : vector<16x16xf32> to vector<16x16xbf16>
    %cst_33 = arith.constant dense<0.000000e+00> : vector<16x16xf32>
    %74 = tpu.matmul %73, %60, %cst_33 {dimension_numbers = #tpu.dot_dimension_numbers<[1], [0], [0], [1], [0, 0, 1, 1], [], []>} : vector<16x16xbf16>, vector<16x16xbf16>, vector<16x16xf32> -> vector<16x16xf32>
    %75 = arith.truncf %74 : vector<16x16xf32> to vector<16x16xbf16>
    %c0_34 = arith.constant 0 : index
    %c0_35 = arith.constant 0 : index
    %c0_36 = arith.constant 0 : index
    %c0_37 = arith.constant 0 : index
    %76 = vector.load %arg6[%c0_34, %c0_35, %c0_36, %c0_37] : memref<2x4x16x32xbf16, #tpu.memory_space<vmem>>, vector<1x1x16x32xbf16>
    %77 = vector.shape_cast %76 : vector<1x1x16x32xbf16> to vector<16x32xbf16>
    %cst_38 = arith.constant dense<0.000000e+00> : vector<16x32xf32>
    %78 = tpu.matmul %75, %77, %cst_38 {dimension_numbers = #tpu.dot_dimension_numbers<[1], [0], [0], [1], [0, 0, 1, 1], [], []>} : vector<16x16xbf16>, vector<16x32xbf16>, vector<16x32xf32> -> vector<16x32xf32>
    %79 = arith.addf %57, %78 : vector<16x32xf32>
    %80 = vector.extract_strided_slice %45 {offsets = [0, 16], sizes = [16, 16], strides = [1, 1]} : vector<16x64xbf16> to vector<16x16xbf16>
    %81 = vector.extract_strided_slice %49 {offsets = [0, 16], sizes = [16, 16], strides = [1, 1]} : vector<16x64xbf16> to vector<16x16xbf16>
    %82 = vector.extract_strided_slice %53 {offsets = [0, 16], sizes = [16, 16], strides = [1, 1]} : vector<16x64xbf16> to vector<16x16xbf16>
    %cst_39 = arith.constant dense<0.000000e+00> : vector<16x16xf32>
    %83 = tpu.matmul %80, %81, %cst_39 {dimension_numbers = #tpu.dot_dimension_numbers<[1], [1], [0], [0], [0, 0, 1, 0], [], []>} : vector<16x16xbf16>, vector<16x16xbf16>, vector<16x16xf32> -> vector<16x16xf32>
    %84 = arith.addf %83, %14 : vector<16x16xf32>
    %cst_40 = arith.constant dense<0xFF800000> : vector<16xf32>
    %85 = vector.multi_reduction <maximumf>, %84, %cst_40 [1] : vector<16x16xf32> to vector<16xf32>
    %86 = vector.shape_cast %85 : vector<16xf32> to vector<16x1xf32>
    %87 = vector.broadcast %86 : vector<16x1xf32> to vector<16x16xf32>
    %88 = arith.subf %84, %87 : vector<16x16xf32>
    %89 = math.exp %88 : vector<16x16xf32>
    %cst_41 = arith.constant dense<0.000000e+00> : vector<16xf32>
    %90 = vector.multi_reduction <add>, %89, %cst_41 [1] : vector<16x16xf32> to vector<16xf32>
    %91 = vector.shape_cast %90 : vector<16xf32> to vector<16x1xf32>
    %92 = tpu.reciprocal %91 {approx = true} : vector<16x1xf32> -> vector<16x1xf32>
    %93 = vector.broadcast %92 : vector<16x1xf32> to vector<16x16xf32>
    %94 = arith.mulf %89, %93 : vector<16x16xf32>
    %95 = arith.truncf %94 : vector<16x16xf32> to vector<16x16xbf16>
    %cst_42 = arith.constant dense<0.000000e+00> : vector<16x16xf32>
    %96 = tpu.matmul %95, %82, %cst_42 {dimension_numbers = #tpu.dot_dimension_numbers<[1], [0], [0], [1], [0, 0, 1, 1], [], []>} : vector<16x16xbf16>, vector<16x16xbf16>, vector<16x16xf32> -> vector<16x16xf32>
    %97 = arith.truncf %96 : vector<16x16xf32> to vector<16x16xbf16>
    %c0_43 = arith.constant 0 : index
    %c1 = arith.constant 1 : index
    %c0_44 = arith.constant 0 : index
    %c0_45 = arith.constant 0 : index
    %98 = vector.load %arg6[%c0_43, %c1, %c0_44, %c0_45] : memref<2x4x16x32xbf16, #tpu.memory_space<vmem>>, vector<1x1x16x32xbf16>
    %99 = vector.shape_cast %98 : vector<1x1x16x32xbf16> to vector<16x32xbf16>
    %cst_46 = arith.constant dense<0.000000e+00> : vector<16x32xf32>
    %100 = tpu.matmul %97, %99, %cst_46 {dimension_numbers = #tpu.dot_dimension_numbers<[1], [0], [0], [1], [0, 0, 1, 1], [], []>} : vector<16x16xbf16>, vector<16x32xbf16>, vector<16x32xf32> -> vector<16x32xf32>
    %101 = arith.addf %79, %100 : vector<16x32xf32>
    %102 = vector.extract_strided_slice %45 {offsets = [0, 32], sizes = [16, 16], strides = [1, 1]} : vector<16x64xbf16> to vector<16x16xbf16>
    %103 = vector.extract_strided_slice %49 {offsets = [0, 32], sizes = [16, 16], strides = [1, 1]} : vector<16x64xbf16> to vector<16x16xbf16>
    %104 = vector.extract_strided_slice %53 {offsets = [0, 32], sizes = [16, 16], strides = [1, 1]} : vector<16x64xbf16> to vector<16x16xbf16>
    %cst_47 = arith.constant dense<0.000000e+00> : vector<16x16xf32>
    %105 = tpu.matmul %102, %103, %cst_47 {dimension_numbers = #tpu.dot_dimension_numbers<[1], [1], [0], [0], [0, 0, 1, 0], [], []>} : vector<16x16xbf16>, vector<16x16xbf16>, vector<16x16xf32> -> vector<16x16xf32>
    %106 = arith.addf %105, %14 : vector<16x16xf32>
    %cst_48 = arith.constant dense<0xFF800000> : vector<16xf32>
    %107 = vector.multi_reduction <maximumf>, %106, %cst_48 [1] : vector<16x16xf32> to vector<16xf32>
    %108 = vector.shape_cast %107 : vector<16xf32> to vector<16x1xf32>
    %109 = vector.broadcast %108 : vector<16x1xf32> to vector<16x16xf32>
    %110 = arith.subf %106, %109 : vector<16x16xf32>
    %111 = math.exp %110 : vector<16x16xf32>
    %cst_49 = arith.constant dense<0.000000e+00> : vector<16xf32>
    %112 = vector.multi_reduction <add>, %111, %cst_49 [1] : vector<16x16xf32> to vector<16xf32>
    %113 = vector.shape_cast %112 : vector<16xf32> to vector<16x1xf32>
    %114 = tpu.reciprocal %113 {approx = true} : vector<16x1xf32> -> vector<16x1xf32>
    %115 = vector.broadcast %114 : vector<16x1xf32> to vector<16x16xf32>
    %116 = arith.mulf %111, %115 : vector<16x16xf32>
    %117 = arith.truncf %116 : vector<16x16xf32> to vector<16x16xbf16>
    %cst_50 = arith.constant dense<0.000000e+00> : vector<16x16xf32>
    %118 = tpu.matmul %117, %104, %cst_50 {dimension_numbers = #tpu.dot_dimension_numbers<[1], [0], [0], [1], [0, 0, 1, 1], [], []>} : vector<16x16xbf16>, vector<16x16xbf16>, vector<16x16xf32> -> vector<16x16xf32>
    %119 = arith.truncf %118 : vector<16x16xf32> to vector<16x16xbf16>
    %c0_51 = arith.constant 0 : index
    %c2 = arith.constant 2 : index
    %c0_52 = arith.constant 0 : index
    %c0_53 = arith.constant 0 : index
    %120 = vector.load %arg6[%c0_51, %c2, %c0_52, %c0_53] : memref<2x4x16x32xbf16, #tpu.memory_space<vmem>>, vector<1x1x16x32xbf16>
    %121 = vector.shape_cast %120 : vector<1x1x16x32xbf16> to vector<16x32xbf16>
    %cst_54 = arith.constant dense<0.000000e+00> : vector<16x32xf32>
    %122 = tpu.matmul %119, %121, %cst_54 {dimension_numbers = #tpu.dot_dimension_numbers<[1], [0], [0], [1], [0, 0, 1, 1], [], []>} : vector<16x16xbf16>, vector<16x32xbf16>, vector<16x32xf32> -> vector<16x32xf32>
    %123 = arith.addf %101, %122 : vector<16x32xf32>
    %124 = vector.extract_strided_slice %45 {offsets = [0, 48], sizes = [16, 16], strides = [1, 1]} : vector<16x64xbf16> to vector<16x16xbf16>
    %125 = vector.extract_strided_slice %49 {offsets = [0, 48], sizes = [16, 16], strides = [1, 1]} : vector<16x64xbf16> to vector<16x16xbf16>
    %126 = vector.extract_strided_slice %53 {offsets = [0, 48], sizes = [16, 16], strides = [1, 1]} : vector<16x64xbf16> to vector<16x16xbf16>
    %cst_55 = arith.constant dense<0.000000e+00> : vector<16x16xf32>
    %127 = tpu.matmul %124, %125, %cst_55 {dimension_numbers = #tpu.dot_dimension_numbers<[1], [1], [0], [0], [0, 0, 1, 0], [], []>} : vector<16x16xbf16>, vector<16x16xbf16>, vector<16x16xf32> -> vector<16x16xf32>
    %128 = arith.addf %127, %14 : vector<16x16xf32>
    %cst_56 = arith.constant dense<0xFF800000> : vector<16xf32>
    %129 = vector.multi_reduction <maximumf>, %128, %cst_56 [1] : vector<16x16xf32> to vector<16xf32>
    %130 = vector.shape_cast %129 : vector<16xf32> to vector<16x1xf32>
    %131 = vector.broadcast %130 : vector<16x1xf32> to vector<16x16xf32>
    %132 = arith.subf %128, %131 : vector<16x16xf32>
    %133 = math.exp %132 : vector<16x16xf32>
    %cst_57 = arith.constant dense<0.000000e+00> : vector<16xf32>
    %134 = vector.multi_reduction <add>, %133, %cst_57 [1] : vector<16x16xf32> to vector<16xf32>
    %135 = vector.shape_cast %134 : vector<16xf32> to vector<16x1xf32>
    %136 = tpu.reciprocal %135 {approx = true} : vector<16x1xf32> -> vector<16x1xf32>
    %137 = vector.broadcast %136 : vector<16x1xf32> to vector<16x16xf32>
    %138 = arith.mulf %133, %137 : vector<16x16xf32>
    %139 = arith.truncf %138 : vector<16x16xf32> to vector<16x16xbf16>
    %cst_58 = arith.constant dense<0.000000e+00> : vector<16x16xf32>
    %140 = tpu.matmul %139, %126, %cst_58 {dimension_numbers = #tpu.dot_dimension_numbers<[1], [0], [0], [1], [0, 0, 1, 1], [], []>} : vector<16x16xbf16>, vector<16x16xbf16>, vector<16x16xf32> -> vector<16x16xf32>
    %141 = arith.truncf %140 : vector<16x16xf32> to vector<16x16xbf16>
    %c0_59 = arith.constant 0 : index
    %c3 = arith.constant 3 : index
    %c0_60 = arith.constant 0 : index
    %c0_61 = arith.constant 0 : index
    %142 = vector.load %arg6[%c0_59, %c3, %c0_60, %c0_61] : memref<2x4x16x32xbf16, #tpu.memory_space<vmem>>, vector<1x1x16x32xbf16>
    %143 = vector.shape_cast %142 : vector<1x1x16x32xbf16> to vector<16x32xbf16>
    %cst_62 = arith.constant dense<0.000000e+00> : vector<16x32xf32>
    %144 = tpu.matmul %141, %143, %cst_62 {dimension_numbers = #tpu.dot_dimension_numbers<[1], [0], [0], [1], [0, 0, 1, 1], [], []>} : vector<16x16xbf16>, vector<16x32xbf16>, vector<16x32xf32> -> vector<16x32xf32>
    %145 = arith.addf %123, %144 : vector<16x32xf32>
    %c0_63 = arith.constant 0 : index
    %c0_64 = arith.constant 0 : index
    %c0_65 = arith.constant 0 : index
    %146 = vector.load %arg8[%c0_63, %c0_64, %c0_65] : memref<2x1x32xf32, #tpu.memory_space<vmem>>, vector<1x1x32xf32>
    %147 = vector.shape_cast %146 : vector<1x1x32xf32> to vector<1x32xf32>
    %c0_66 = arith.constant 0 : index
    %c0_67 = arith.constant 0 : index
    %c0_68 = arith.constant 0 : index
    %148 = vector.load %arg9[%c0_66, %c0_67, %c0_68] : memref<2x1x32xf32, #tpu.memory_space<vmem>>, vector<1x1x32xf32>
    %149 = vector.shape_cast %148 : vector<1x1x32xf32> to vector<1x32xf32>
    %cst_69 = arith.constant dense<0.000000e+00> : vector<16xf32>
    %150 = vector.multi_reduction <add>, %145, %cst_69 [1] : vector<16x32xf32> to vector<16xf32>
    %151 = vector.shape_cast %150 : vector<16xf32> to vector<16x1xf32>
    %cst_70 = arith.constant 3.200000e+01 : f32
    %152 = vector.broadcast %cst_70 : f32 to vector<16x1xf32>
    %153 = arith.divf %151, %152 : vector<16x1xf32>
    %154 = vector.broadcast %153 : vector<16x1xf32> to vector<16x32xf32>
    %155 = arith.subf %145, %154 : vector<16x32xf32>
    %156 = arith.mulf %155, %155 : vector<16x32xf32>
    %cst_71 = arith.constant dense<0.000000e+00> : vector<16xf32>
    %157 = vector.multi_reduction <add>, %156, %cst_71 [1] : vector<16x32xf32> to vector<16xf32>
    %158 = vector.shape_cast %157 : vector<16xf32> to vector<16x1xf32>
    %cst_72 = arith.constant 3.200000e+01 : f32
    %159 = vector.broadcast %cst_72 : f32 to vector<16x1xf32>
    %160 = arith.divf %158, %159 : vector<16x1xf32>
    %161 = vector.broadcast %153 : vector<16x1xf32> to vector<16x32xf32>
    %162 = arith.subf %145, %161 : vector<16x32xf32>
    %cst_73 = arith.constant 9.99999974E-6 : f32
    %163 = vector.broadcast %cst_73 : f32 to vector<16x1xf32>
    %164 = arith.addf %160, %163 : vector<16x1xf32>
    %165 = math.rsqrt %164 : vector<16x1xf32>
    %166 = vector.broadcast %165 : vector<16x1xf32> to vector<16x32xf32>
    %167 = arith.mulf %162, %166 : vector<16x32xf32>
    %168 = vector.broadcast %147 : vector<1x32xf32> to vector<16x32xf32>
    %169 = arith.mulf %167, %168 : vector<16x32xf32>
    %170 = vector.broadcast %149 : vector<1x32xf32> to vector<16x32xf32>
    %171 = arith.addf %169, %170 : vector<16x32xf32>
    %172 = arith.truncf %171 : vector<16x32xf32> to vector<16x32xbf16>
    %c0_74 = arith.constant 0 : index
    %c0_75 = arith.constant 0 : index
    %c0_76 = arith.constant 0 : index
    %173 = vector.load %arg10[%c0_74, %c0_75, %c0_76] : memref<2x32x64xbf16, #tpu.memory_space<vmem>>, vector<1x32x64xbf16>
    %174 = vector.shape_cast %173 : vector<1x32x64xbf16> to vector<32x64xbf16>
    %cst_77 = arith.constant dense<0.000000e+00> : vector<16x64xf32>
    %175 = tpu.matmul %172, %174, %cst_77 {dimension_numbers = #tpu.dot_dimension_numbers<[1], [0], [0], [1], [0, 0, 1, 1], [], []>} : vector<16x32xbf16>, vector<32x64xbf16>, vector<16x64xf32> -> vector<16x64xf32>
    %c0_78 = arith.constant 0 : index
    %c0_79 = arith.constant 0 : index
    %c0_80 = arith.constant 0 : index
    %176 = vector.load %arg11[%c0_78, %c0_79, %c0_80] : memref<2x1x64xf32, #tpu.memory_space<vmem>>, vector<1x1x64xf32>
    %177 = vector.shape_cast %176 : vector<1x1x64xf32> to vector<1x64xf32>
    %178 = vector.broadcast %177 : vector<1x64xf32> to vector<16x64xf32>
    %179 = arith.addf %175, %178 : vector<16x64xf32>
    %cst_81 = arith.constant 5.000000e-01 : f32
    %180 = vector.broadcast %cst_81 : f32 to vector<16x64xf32>
    %181 = arith.mulf %180, %179 : vector<16x64xf32>
    %cst_82 = arith.constant 0.707106769 : f32
    %182 = vector.broadcast %cst_82 : f32 to vector<16x64xf32>
    %183 = arith.mulf %179, %182 : vector<16x64xf32>
    %184 = math.absf %183 : vector<16x64xf32>
    %cst_83 = arith.constant 0.327591091 : f32
    %185 = vector.broadcast %cst_83 : f32 to vector<16x64xf32>
    %186 = arith.mulf %185, %184 : vector<16x64xf32>
    %cst_84 = arith.constant 1.000000e+00 : f32
    %187 = vector.broadcast %cst_84 : f32 to vector<16x64xf32>
    %188 = arith.addf %187, %186 : vector<16x64xf32>
    %cst_85 = arith.constant 1.000000e+00 : f32
    %189 = vector.broadcast %cst_85 : f32 to vector<16x64xf32>
    %190 = arith.divf %189, %188 : vector<16x64xf32>
    %cst_86 = arith.constant 1.06140542 : f32
    %191 = vector.broadcast %cst_86 : f32 to vector<16x64xf32>
    %192 = arith.mulf %191, %190 : vector<16x64xf32>
    %cst_87 = arith.constant 1.45315206 : f32
    %193 = vector.broadcast %cst_87 : f32 to vector<16x64xf32>
    %194 = arith.subf %192, %193 : vector<16x64xf32>
    %195 = arith.mulf %194, %190 : vector<16x64xf32>
    %cst_88 = arith.constant 1.42141378 : f32
    %196 = vector.broadcast %cst_88 : f32 to vector<16x64xf32>
    %197 = arith.addf %195, %196 : vector<16x64xf32>
    %198 = arith.mulf %197, %190 : vector<16x64xf32>
    %cst_89 = arith.constant 0.284496725 : f32
    %199 = vector.broadcast %cst_89 : f32 to vector<16x64xf32>
    %200 = arith.subf %198, %199 : vector<16x64xf32>
    %201 = arith.mulf %200, %190 : vector<16x64xf32>
    %cst_90 = arith.constant 0.254829586 : f32
    %202 = vector.broadcast %cst_90 : f32 to vector<16x64xf32>
    %203 = arith.addf %201, %202 : vector<16x64xf32>
    %204 = arith.mulf %203, %190 : vector<16x64xf32>
    %cst_91 = arith.constant 0.000000e+00 : f32
    %205 = vector.broadcast %cst_91 : f32 to vector<16x64xf32>
    %206 = arith.subf %205, %184 : vector<16x64xf32>
    %207 = arith.mulf %206, %184 : vector<16x64xf32>
    %208 = math.exp %207 : vector<16x64xf32>
    %209 = arith.mulf %204, %208 : vector<16x64xf32>
    %cst_92 = arith.constant 1.000000e+00 : f32
    %210 = vector.broadcast %cst_92 : f32 to vector<16x64xf32>
    %211 = arith.subf %210, %209 : vector<16x64xf32>
    %cst_93 = arith.constant 0.000000e+00 : f32
    %212 = vector.broadcast %cst_93 : f32 to vector<16x64xf32>
    %213 = arith.cmpf olt, %183, %212 : vector<16x64xf32>
    %cst_94 = arith.constant 0.000000e+00 : f32
    %214 = vector.broadcast %cst_94 : f32 to vector<16x64xf32>
    %215 = arith.subf %214, %211 : vector<16x64xf32>
    %216 = arith.select %213, %215, %211 : vector<16x64xi1>, vector<16x64xf32>
    %cst_95 = arith.constant 1.000000e+00 : f32
    %217 = vector.broadcast %cst_95 : f32 to vector<16x64xf32>
    %218 = arith.addf %217, %216 : vector<16x64xf32>
    %219 = arith.mulf %181, %218 : vector<16x64xf32>
    %220 = arith.truncf %219 : vector<16x64xf32> to vector<16x64xbf16>
    %c0_96 = arith.constant 0 : index
    %c0_97 = arith.constant 0 : index
    %c0_98 = arith.constant 0 : index
    %221 = vector.load %arg12[%c0_96, %c0_97, %c0_98] : memref<2x64x32xbf16, #tpu.memory_space<vmem>>, vector<1x64x32xbf16>
    %222 = vector.shape_cast %221 : vector<1x64x32xbf16> to vector<64x32xbf16>
    %cst_99 = arith.constant dense<0.000000e+00> : vector<16x32xf32>
    %223 = tpu.matmul %220, %222, %cst_99 {dimension_numbers = #tpu.dot_dimension_numbers<[1], [0], [0], [1], [0, 0, 1, 1], [], []>} : vector<16x64xbf16>, vector<64x32xbf16>, vector<16x32xf32> -> vector<16x32xf32>
    %224 = arith.addf %145, %223 : vector<16x32xf32>
    %c0_100 = arith.constant 0 : index
    %c0_101 = arith.constant 0 : index
    %c0_102 = arith.constant 0 : index
    %225 = vector.load %arg13[%c0_100, %c0_101, %c0_102] : memref<2x1x32xf32, #tpu.memory_space<vmem>>, vector<1x1x32xf32>
    %226 = vector.shape_cast %225 : vector<1x1x32xf32> to vector<1x32xf32>
    %227 = vector.broadcast %226 : vector<1x32xf32> to vector<16x32xf32>
    %228 = arith.addf %224, %227 : vector<16x32xf32>
    %c1_103 = arith.constant 1 : index
    %c0_104 = arith.constant 0 : index
    %c0_105 = arith.constant 0 : index
    %229 = vector.load %arg1[%c1_103, %c0_104, %c0_105] : memref<2x1x32xf32, #tpu.memory_space<vmem>>, vector<1x1x32xf32>
    %230 = vector.shape_cast %229 : vector<1x1x32xf32> to vector<1x32xf32>
    %c1_106 = arith.constant 1 : index
    %c0_107 = arith.constant 0 : index
    %c0_108 = arith.constant 0 : index
    %231 = vector.load %arg2[%c1_106, %c0_107, %c0_108] : memref<2x1x32xf32, #tpu.memory_space<vmem>>, vector<1x1x32xf32>
    %232 = vector.shape_cast %231 : vector<1x1x32xf32> to vector<1x32xf32>
    %cst_109 = arith.constant dense<0.000000e+00> : vector<16xf32>
    %233 = vector.multi_reduction <add>, %228, %cst_109 [1] : vector<16x32xf32> to vector<16xf32>
    %234 = vector.shape_cast %233 : vector<16xf32> to vector<16x1xf32>
    %cst_110 = arith.constant 3.200000e+01 : f32
    %235 = vector.broadcast %cst_110 : f32 to vector<16x1xf32>
    %236 = arith.divf %234, %235 : vector<16x1xf32>
    %237 = vector.broadcast %236 : vector<16x1xf32> to vector<16x32xf32>
    %238 = arith.subf %228, %237 : vector<16x32xf32>
    %239 = arith.mulf %238, %238 : vector<16x32xf32>
    %cst_111 = arith.constant dense<0.000000e+00> : vector<16xf32>
    %240 = vector.multi_reduction <add>, %239, %cst_111 [1] : vector<16x32xf32> to vector<16xf32>
    %241 = vector.shape_cast %240 : vector<16xf32> to vector<16x1xf32>
    %cst_112 = arith.constant 3.200000e+01 : f32
    %242 = vector.broadcast %cst_112 : f32 to vector<16x1xf32>
    %243 = arith.divf %241, %242 : vector<16x1xf32>
    %244 = vector.broadcast %236 : vector<16x1xf32> to vector<16x32xf32>
    %245 = arith.subf %228, %244 : vector<16x32xf32>
    %cst_113 = arith.constant 9.99999974E-6 : f32
    %246 = vector.broadcast %cst_113 : f32 to vector<16x1xf32>
    %247 = arith.addf %243, %246 : vector<16x1xf32>
    %248 = math.rsqrt %247 : vector<16x1xf32>
    %249 = vector.broadcast %248 : vector<16x1xf32> to vector<16x32xf32>
    %250 = arith.mulf %245, %249 : vector<16x32xf32>
    %251 = vector.broadcast %230 : vector<1x32xf32> to vector<16x32xf32>
    %252 = arith.mulf %250, %251 : vector<16x32xf32>
    %253 = vector.broadcast %232 : vector<1x32xf32> to vector<16x32xf32>
    %254 = arith.addf %252, %253 : vector<16x32xf32>
    %255 = arith.truncf %254 : vector<16x32xf32> to vector<16x32xbf16>
    %c1_114 = arith.constant 1 : index
    %c0_115 = arith.constant 0 : index
    %c0_116 = arith.constant 0 : index
    %256 = vector.load %arg3[%c1_114, %c0_115, %c0_116] : memref<2x32x64xbf16, #tpu.memory_space<vmem>>, vector<1x32x64xbf16>
    %257 = vector.shape_cast %256 : vector<1x32x64xbf16> to vector<32x64xbf16>
    %cst_117 = arith.constant dense<0.000000e+00> : vector<16x64xf32>
    %258 = tpu.matmul %255, %257, %cst_117 {dimension_numbers = #tpu.dot_dimension_numbers<[1], [0], [0], [1], [0, 0, 1, 1], [], []>} : vector<16x32xbf16>, vector<32x64xbf16>, vector<16x64xf32> -> vector<16x64xf32>
    %259 = arith.truncf %258 : vector<16x64xf32> to vector<16x64xbf16>
    %c1_118 = arith.constant 1 : index
    %c0_119 = arith.constant 0 : index
    %c0_120 = arith.constant 0 : index
    %260 = vector.load %arg4[%c1_118, %c0_119, %c0_120] : memref<2x32x64xbf16, #tpu.memory_space<vmem>>, vector<1x32x64xbf16>
    %261 = vector.shape_cast %260 : vector<1x32x64xbf16> to vector<32x64xbf16>
    %cst_121 = arith.constant dense<0.000000e+00> : vector<16x64xf32>
    %262 = tpu.matmul %255, %261, %cst_121 {dimension_numbers = #tpu.dot_dimension_numbers<[1], [0], [0], [1], [0, 0, 1, 1], [], []>} : vector<16x32xbf16>, vector<32x64xbf16>, vector<16x64xf32> -> vector<16x64xf32>
    %263 = arith.truncf %262 : vector<16x64xf32> to vector<16x64xbf16>
    %c1_122 = arith.constant 1 : index
    %c0_123 = arith.constant 0 : index
    %c0_124 = arith.constant 0 : index
    %264 = vector.load %arg5[%c1_122, %c0_123, %c0_124] : memref<2x32x64xbf16, #tpu.memory_space<vmem>>, vector<1x32x64xbf16>
    %265 = vector.shape_cast %264 : vector<1x32x64xbf16> to vector<32x64xbf16>
    %cst_125 = arith.constant dense<0.000000e+00> : vector<16x64xf32>
    %266 = tpu.matmul %255, %265, %cst_125 {dimension_numbers = #tpu.dot_dimension_numbers<[1], [0], [0], [1], [0, 0, 1, 1], [], []>} : vector<16x32xbf16>, vector<32x64xbf16>, vector<16x64xf32> -> vector<16x64xf32>
    %267 = arith.truncf %266 : vector<16x64xf32> to vector<16x64xbf16>
    %c1_126 = arith.constant 1 : index
    %c0_127 = arith.constant 0 : index
    %c0_128 = arith.constant 0 : index
    %268 = vector.load %arg7[%c1_126, %c0_127, %c0_128] : memref<2x1x32xf32, #tpu.memory_space<vmem>>, vector<1x1x32xf32>
    %269 = vector.shape_cast %268 : vector<1x1x32xf32> to vector<1x32xf32>
    %270 = vector.broadcast %269 : vector<1x32xf32> to vector<16x32xf32>
    %271 = arith.addf %228, %270 : vector<16x32xf32>
    %272 = vector.extract_strided_slice %259 {offsets = [0, 0], sizes = [16, 16], strides = [1, 1]} : vector<16x64xbf16> to vector<16x16xbf16>
    %273 = vector.extract_strided_slice %263 {offsets = [0, 0], sizes = [16, 16], strides = [1, 1]} : vector<16x64xbf16> to vector<16x16xbf16>
    %274 = vector.extract_strided_slice %267 {offsets = [0, 0], sizes = [16, 16], strides = [1, 1]} : vector<16x64xbf16> to vector<16x16xbf16>
    %cst_129 = arith.constant dense<0.000000e+00> : vector<16x16xf32>
    %275 = tpu.matmul %272, %273, %cst_129 {dimension_numbers = #tpu.dot_dimension_numbers<[1], [1], [0], [0], [0, 0, 1, 0], [], []>} : vector<16x16xbf16>, vector<16x16xbf16>, vector<16x16xf32> -> vector<16x16xf32>
    %276 = arith.addf %275, %14 : vector<16x16xf32>
    %cst_130 = arith.constant dense<0xFF800000> : vector<16xf32>
    %277 = vector.multi_reduction <maximumf>, %276, %cst_130 [1] : vector<16x16xf32> to vector<16xf32>
    %278 = vector.shape_cast %277 : vector<16xf32> to vector<16x1xf32>
    %279 = vector.broadcast %278 : vector<16x1xf32> to vector<16x16xf32>
    %280 = arith.subf %276, %279 : vector<16x16xf32>
    %281 = math.exp %280 : vector<16x16xf32>
    %cst_131 = arith.constant dense<0.000000e+00> : vector<16xf32>
    %282 = vector.multi_reduction <add>, %281, %cst_131 [1] : vector<16x16xf32> to vector<16xf32>
    %283 = vector.shape_cast %282 : vector<16xf32> to vector<16x1xf32>
    %284 = tpu.reciprocal %283 {approx = true} : vector<16x1xf32> -> vector<16x1xf32>
    %285 = vector.broadcast %284 : vector<16x1xf32> to vector<16x16xf32>
    %286 = arith.mulf %281, %285 : vector<16x16xf32>
    %287 = arith.truncf %286 : vector<16x16xf32> to vector<16x16xbf16>
    %cst_132 = arith.constant dense<0.000000e+00> : vector<16x16xf32>
    %288 = tpu.matmul %287, %274, %cst_132 {dimension_numbers = #tpu.dot_dimension_numbers<[1], [0], [0], [1], [0, 0, 1, 1], [], []>} : vector<16x16xbf16>, vector<16x16xbf16>, vector<16x16xf32> -> vector<16x16xf32>
    %289 = arith.truncf %288 : vector<16x16xf32> to vector<16x16xbf16>
    %c1_133 = arith.constant 1 : index
    %c0_134 = arith.constant 0 : index
    %c0_135 = arith.constant 0 : index
    %c0_136 = arith.constant 0 : index
    %290 = vector.load %arg6[%c1_133, %c0_134, %c0_135, %c0_136] : memref<2x4x16x32xbf16, #tpu.memory_space<vmem>>, vector<1x1x16x32xbf16>
    %291 = vector.shape_cast %290 : vector<1x1x16x32xbf16> to vector<16x32xbf16>
    %cst_137 = arith.constant dense<0.000000e+00> : vector<16x32xf32>
    %292 = tpu.matmul %289, %291, %cst_137 {dimension_numbers = #tpu.dot_dimension_numbers<[1], [0], [0], [1], [0, 0, 1, 1], [], []>} : vector<16x16xbf16>, vector<16x32xbf16>, vector<16x32xf32> -> vector<16x32xf32>
    %293 = arith.addf %271, %292 : vector<16x32xf32>
    %294 = vector.extract_strided_slice %259 {offsets = [0, 16], sizes = [16, 16], strides = [1, 1]} : vector<16x64xbf16> to vector<16x16xbf16>
    %295 = vector.extract_strided_slice %263 {offsets = [0, 16], sizes = [16, 16], strides = [1, 1]} : vector<16x64xbf16> to vector<16x16xbf16>
    %296 = vector.extract_strided_slice %267 {offsets = [0, 16], sizes = [16, 16], strides = [1, 1]} : vector<16x64xbf16> to vector<16x16xbf16>
    %cst_138 = arith.constant dense<0.000000e+00> : vector<16x16xf32>
    %297 = tpu.matmul %294, %295, %cst_138 {dimension_numbers = #tpu.dot_dimension_numbers<[1], [1], [0], [0], [0, 0, 1, 0], [], []>} : vector<16x16xbf16>, vector<16x16xbf16>, vector<16x16xf32> -> vector<16x16xf32>
    %298 = arith.addf %297, %14 : vector<16x16xf32>
    %cst_139 = arith.constant dense<0xFF800000> : vector<16xf32>
    %299 = vector.multi_reduction <maximumf>, %298, %cst_139 [1] : vector<16x16xf32> to vector<16xf32>
    %300 = vector.shape_cast %299 : vector<16xf32> to vector<16x1xf32>
    %301 = vector.broadcast %300 : vector<16x1xf32> to vector<16x16xf32>
    %302 = arith.subf %298, %301 : vector<16x16xf32>
    %303 = math.exp %302 : vector<16x16xf32>
    %cst_140 = arith.constant dense<0.000000e+00> : vector<16xf32>
    %304 = vector.multi_reduction <add>, %303, %cst_140 [1] : vector<16x16xf32> to vector<16xf32>
    %305 = vector.shape_cast %304 : vector<16xf32> to vector<16x1xf32>
    %306 = tpu.reciprocal %305 {approx = true} : vector<16x1xf32> -> vector<16x1xf32>
    %307 = vector.broadcast %306 : vector<16x1xf32> to vector<16x16xf32>
    %308 = arith.mulf %303, %307 : vector<16x16xf32>
    %309 = arith.truncf %308 : vector<16x16xf32> to vector<16x16xbf16>
    %cst_141 = arith.constant dense<0.000000e+00> : vector<16x16xf32>
    %310 = tpu.matmul %309, %296, %cst_141 {dimension_numbers = #tpu.dot_dimension_numbers<[1], [0], [0], [1], [0, 0, 1, 1], [], []>} : vector<16x16xbf16>, vector<16x16xbf16>, vector<16x16xf32> -> vector<16x16xf32>
    %311 = arith.truncf %310 : vector<16x16xf32> to vector<16x16xbf16>
    %c1_142 = arith.constant 1 : index
    %c1_143 = arith.constant 1 : index
    %c0_144 = arith.constant 0 : index
    %c0_145 = arith.constant 0 : index
    %312 = vector.load %arg6[%c1_142, %c1_143, %c0_144, %c0_145] : memref<2x4x16x32xbf16, #tpu.memory_space<vmem>>, vector<1x1x16x32xbf16>
    %313 = vector.shape_cast %312 : vector<1x1x16x32xbf16> to vector<16x32xbf16>
    %cst_146 = arith.constant dense<0.000000e+00> : vector<16x32xf32>
    %314 = tpu.matmul %311, %313, %cst_146 {dimension_numbers = #tpu.dot_dimension_numbers<[1], [0], [0], [1], [0, 0, 1, 1], [], []>} : vector<16x16xbf16>, vector<16x32xbf16>, vector<16x32xf32> -> vector<16x32xf32>
    %315 = arith.addf %293, %314 : vector<16x32xf32>
    %316 = vector.extract_strided_slice %259 {offsets = [0, 32], sizes = [16, 16], strides = [1, 1]} : vector<16x64xbf16> to vector<16x16xbf16>
    %317 = vector.extract_strided_slice %263 {offsets = [0, 32], sizes = [16, 16], strides = [1, 1]} : vector<16x64xbf16> to vector<16x16xbf16>
    %318 = vector.extract_strided_slice %267 {offsets = [0, 32], sizes = [16, 16], strides = [1, 1]} : vector<16x64xbf16> to vector<16x16xbf16>
    %cst_147 = arith.constant dense<0.000000e+00> : vector<16x16xf32>
    %319 = tpu.matmul %316, %317, %cst_147 {dimension_numbers = #tpu.dot_dimension_numbers<[1], [1], [0], [0], [0, 0, 1, 0], [], []>} : vector<16x16xbf16>, vector<16x16xbf16>, vector<16x16xf32> -> vector<16x16xf32>
    %320 = arith.addf %319, %14 : vector<16x16xf32>
    %cst_148 = arith.constant dense<0xFF800000> : vector<16xf32>
    %321 = vector.multi_reduction <maximumf>, %320, %cst_148 [1] : vector<16x16xf32> to vector<16xf32>
    %322 = vector.shape_cast %321 : vector<16xf32> to vector<16x1xf32>
    %323 = vector.broadcast %322 : vector<16x1xf32> to vector<16x16xf32>
    %324 = arith.subf %320, %323 : vector<16x16xf32>
    %325 = math.exp %324 : vector<16x16xf32>
    %cst_149 = arith.constant dense<0.000000e+00> : vector<16xf32>
    %326 = vector.multi_reduction <add>, %325, %cst_149 [1] : vector<16x16xf32> to vector<16xf32>
    %327 = vector.shape_cast %326 : vector<16xf32> to vector<16x1xf32>
    %328 = tpu.reciprocal %327 {approx = true} : vector<16x1xf32> -> vector<16x1xf32>
    %329 = vector.broadcast %328 : vector<16x1xf32> to vector<16x16xf32>
    %330 = arith.mulf %325, %329 : vector<16x16xf32>
    %331 = arith.truncf %330 : vector<16x16xf32> to vector<16x16xbf16>
    %cst_150 = arith.constant dense<0.000000e+00> : vector<16x16xf32>
    %332 = tpu.matmul %331, %318, %cst_150 {dimension_numbers = #tpu.dot_dimension_numbers<[1], [0], [0], [1], [0, 0, 1, 1], [], []>} : vector<16x16xbf16>, vector<16x16xbf16>, vector<16x16xf32> -> vector<16x16xf32>
    %333 = arith.truncf %332 : vector<16x16xf32> to vector<16x16xbf16>
    %c1_151 = arith.constant 1 : index
    %c2_152 = arith.constant 2 : index
    %c0_153 = arith.constant 0 : index
    %c0_154 = arith.constant 0 : index
    %334 = vector.load %arg6[%c1_151, %c2_152, %c0_153, %c0_154] : memref<2x4x16x32xbf16, #tpu.memory_space<vmem>>, vector<1x1x16x32xbf16>
    %335 = vector.shape_cast %334 : vector<1x1x16x32xbf16> to vector<16x32xbf16>
    %cst_155 = arith.constant dense<0.000000e+00> : vector<16x32xf32>
    %336 = tpu.matmul %333, %335, %cst_155 {dimension_numbers = #tpu.dot_dimension_numbers<[1], [0], [0], [1], [0, 0, 1, 1], [], []>} : vector<16x16xbf16>, vector<16x32xbf16>, vector<16x32xf32> -> vector<16x32xf32>
    %337 = arith.addf %315, %336 : vector<16x32xf32>
    %338 = vector.extract_strided_slice %259 {offsets = [0, 48], sizes = [16, 16], strides = [1, 1]} : vector<16x64xbf16> to vector<16x16xbf16>
    %339 = vector.extract_strided_slice %263 {offsets = [0, 48], sizes = [16, 16], strides = [1, 1]} : vector<16x64xbf16> to vector<16x16xbf16>
    %340 = vector.extract_strided_slice %267 {offsets = [0, 48], sizes = [16, 16], strides = [1, 1]} : vector<16x64xbf16> to vector<16x16xbf16>
    %cst_156 = arith.constant dense<0.000000e+00> : vector<16x16xf32>
    %341 = tpu.matmul %338, %339, %cst_156 {dimension_numbers = #tpu.dot_dimension_numbers<[1], [1], [0], [0], [0, 0, 1, 0], [], []>} : vector<16x16xbf16>, vector<16x16xbf16>, vector<16x16xf32> -> vector<16x16xf32>
    %342 = arith.addf %341, %14 : vector<16x16xf32>
    %cst_157 = arith.constant dense<0xFF800000> : vector<16xf32>
    %343 = vector.multi_reduction <maximumf>, %342, %cst_157 [1] : vector<16x16xf32> to vector<16xf32>
    %344 = vector.shape_cast %343 : vector<16xf32> to vector<16x1xf32>
    %345 = vector.broadcast %344 : vector<16x1xf32> to vector<16x16xf32>
    %346 = arith.subf %342, %345 : vector<16x16xf32>
    %347 = math.exp %346 : vector<16x16xf32>
    %cst_158 = arith.constant dense<0.000000e+00> : vector<16xf32>
    %348 = vector.multi_reduction <add>, %347, %cst_158 [1] : vector<16x16xf32> to vector<16xf32>
    %349 = vector.shape_cast %348 : vector<16xf32> to vector<16x1xf32>
    %350 = tpu.reciprocal %349 {approx = true} : vector<16x1xf32> -> vector<16x1xf32>
    %351 = vector.broadcast %350 : vector<16x1xf32> to vector<16x16xf32>
    %352 = arith.mulf %347, %351 : vector<16x16xf32>
    %353 = arith.truncf %352 : vector<16x16xf32> to vector<16x16xbf16>
    %cst_159 = arith.constant dense<0.000000e+00> : vector<16x16xf32>
    %354 = tpu.matmul %353, %340, %cst_159 {dimension_numbers = #tpu.dot_dimension_numbers<[1], [0], [0], [1], [0, 0, 1, 1], [], []>} : vector<16x16xbf16>, vector<16x16xbf16>, vector<16x16xf32> -> vector<16x16xf32>
    %355 = arith.truncf %354 : vector<16x16xf32> to vector<16x16xbf16>
    %c1_160 = arith.constant 1 : index
    %c3_161 = arith.constant 3 : index
    %c0_162 = arith.constant 0 : index
    %c0_163 = arith.constant 0 : index
    %356 = vector.load %arg6[%c1_160, %c3_161, %c0_162, %c0_163] : memref<2x4x16x32xbf16, #tpu.memory_space<vmem>>, vector<1x1x16x32xbf16>
    %357 = vector.shape_cast %356 : vector<1x1x16x32xbf16> to vector<16x32xbf16>
    %cst_164 = arith.constant dense<0.000000e+00> : vector<16x32xf32>
    %358 = tpu.matmul %355, %357, %cst_164 {dimension_numbers = #tpu.dot_dimension_numbers<[1], [0], [0], [1], [0, 0, 1, 1], [], []>} : vector<16x16xbf16>, vector<16x32xbf16>, vector<16x32xf32> -> vector<16x32xf32>
    %359 = arith.addf %337, %358 : vector<16x32xf32>
    %c1_165 = arith.constant 1 : index
    %c0_166 = arith.constant 0 : index
    %c0_167 = arith.constant 0 : index
    %360 = vector.load %arg8[%c1_165, %c0_166, %c0_167] : memref<2x1x32xf32, #tpu.memory_space<vmem>>, vector<1x1x32xf32>
    %361 = vector.shape_cast %360 : vector<1x1x32xf32> to vector<1x32xf32>
    %c1_168 = arith.constant 1 : index
    %c0_169 = arith.constant 0 : index
    %c0_170 = arith.constant 0 : index
    %362 = vector.load %arg9[%c1_168, %c0_169, %c0_170] : memref<2x1x32xf32, #tpu.memory_space<vmem>>, vector<1x1x32xf32>
    %363 = vector.shape_cast %362 : vector<1x1x32xf32> to vector<1x32xf32>
    %cst_171 = arith.constant dense<0.000000e+00> : vector<16xf32>
    %364 = vector.multi_reduction <add>, %359, %cst_171 [1] : vector<16x32xf32> to vector<16xf32>
    %365 = vector.shape_cast %364 : vector<16xf32> to vector<16x1xf32>
    %cst_172 = arith.constant 3.200000e+01 : f32
    %366 = vector.broadcast %cst_172 : f32 to vector<16x1xf32>
    %367 = arith.divf %365, %366 : vector<16x1xf32>
    %368 = vector.broadcast %367 : vector<16x1xf32> to vector<16x32xf32>
    %369 = arith.subf %359, %368 : vector<16x32xf32>
    %370 = arith.mulf %369, %369 : vector<16x32xf32>
    %cst_173 = arith.constant dense<0.000000e+00> : vector<16xf32>
    %371 = vector.multi_reduction <add>, %370, %cst_173 [1] : vector<16x32xf32> to vector<16xf32>
    %372 = vector.shape_cast %371 : vector<16xf32> to vector<16x1xf32>
    %cst_174 = arith.constant 3.200000e+01 : f32
    %373 = vector.broadcast %cst_174 : f32 to vector<16x1xf32>
    %374 = arith.divf %372, %373 : vector<16x1xf32>
    %375 = vector.broadcast %367 : vector<16x1xf32> to vector<16x32xf32>
    %376 = arith.subf %359, %375 : vector<16x32xf32>
    %cst_175 = arith.constant 9.99999974E-6 : f32
    %377 = vector.broadcast %cst_175 : f32 to vector<16x1xf32>
    %378 = arith.addf %374, %377 : vector<16x1xf32>
    %379 = math.rsqrt %378 : vector<16x1xf32>
    %380 = vector.broadcast %379 : vector<16x1xf32> to vector<16x32xf32>
    %381 = arith.mulf %376, %380 : vector<16x32xf32>
    %382 = vector.broadcast %361 : vector<1x32xf32> to vector<16x32xf32>
    %383 = arith.mulf %381, %382 : vector<16x32xf32>
    %384 = vector.broadcast %363 : vector<1x32xf32> to vector<16x32xf32>
    %385 = arith.addf %383, %384 : vector<16x32xf32>
    %386 = arith.truncf %385 : vector<16x32xf32> to vector<16x32xbf16>
    %c1_176 = arith.constant 1 : index
    %c0_177 = arith.constant 0 : index
    %c0_178 = arith.constant 0 : index
    %387 = vector.load %arg10[%c1_176, %c0_177, %c0_178] : memref<2x32x64xbf16, #tpu.memory_space<vmem>>, vector<1x32x64xbf16>
    %388 = vector.shape_cast %387 : vector<1x32x64xbf16> to vector<32x64xbf16>
    %cst_179 = arith.constant dense<0.000000e+00> : vector<16x64xf32>
    %389 = tpu.matmul %386, %388, %cst_179 {dimension_numbers = #tpu.dot_dimension_numbers<[1], [0], [0], [1], [0, 0, 1, 1], [], []>} : vector<16x32xbf16>, vector<32x64xbf16>, vector<16x64xf32> -> vector<16x64xf32>
    %c1_180 = arith.constant 1 : index
    %c0_181 = arith.constant 0 : index
    %c0_182 = arith.constant 0 : index
    %390 = vector.load %arg11[%c1_180, %c0_181, %c0_182] : memref<2x1x64xf32, #tpu.memory_space<vmem>>, vector<1x1x64xf32>
    %391 = vector.shape_cast %390 : vector<1x1x64xf32> to vector<1x64xf32>
    %392 = vector.broadcast %391 : vector<1x64xf32> to vector<16x64xf32>
    %393 = arith.addf %389, %392 : vector<16x64xf32>
    %cst_183 = arith.constant 5.000000e-01 : f32
    %394 = vector.broadcast %cst_183 : f32 to vector<16x64xf32>
    %395 = arith.mulf %394, %393 : vector<16x64xf32>
    %cst_184 = arith.constant 0.707106769 : f32
    %396 = vector.broadcast %cst_184 : f32 to vector<16x64xf32>
    %397 = arith.mulf %393, %396 : vector<16x64xf32>
    %398 = math.absf %397 : vector<16x64xf32>
    %cst_185 = arith.constant 0.327591091 : f32
    %399 = vector.broadcast %cst_185 : f32 to vector<16x64xf32>
    %400 = arith.mulf %399, %398 : vector<16x64xf32>
    %cst_186 = arith.constant 1.000000e+00 : f32
    %401 = vector.broadcast %cst_186 : f32 to vector<16x64xf32>
    %402 = arith.addf %401, %400 : vector<16x64xf32>
    %cst_187 = arith.constant 1.000000e+00 : f32
    %403 = vector.broadcast %cst_187 : f32 to vector<16x64xf32>
    %404 = arith.divf %403, %402 : vector<16x64xf32>
    %cst_188 = arith.constant 1.06140542 : f32
    %405 = vector.broadcast %cst_188 : f32 to vector<16x64xf32>
    %406 = arith.mulf %405, %404 : vector<16x64xf32>
    %cst_189 = arith.constant 1.45315206 : f32
    %407 = vector.broadcast %cst_189 : f32 to vector<16x64xf32>
    %408 = arith.subf %406, %407 : vector<16x64xf32>
    %409 = arith.mulf %408, %404 : vector<16x64xf32>
    %cst_190 = arith.constant 1.42141378 : f32
    %410 = vector.broadcast %cst_190 : f32 to vector<16x64xf32>
    %411 = arith.addf %409, %410 : vector<16x64xf32>
    %412 = arith.mulf %411, %404 : vector<16x64xf32>
    %cst_191 = arith.constant 0.284496725 : f32
    %413 = vector.broadcast %cst_191 : f32 to vector<16x64xf32>
    %414 = arith.subf %412, %413 : vector<16x64xf32>
    %415 = arith.mulf %414, %404 : vector<16x64xf32>
    %cst_192 = arith.constant 0.254829586 : f32
    %416 = vector.broadcast %cst_192 : f32 to vector<16x64xf32>
    %417 = arith.addf %415, %416 : vector<16x64xf32>
    %418 = arith.mulf %417, %404 : vector<16x64xf32>
    %cst_193 = arith.constant 0.000000e+00 : f32
    %419 = vector.broadcast %cst_193 : f32 to vector<16x64xf32>
    %420 = arith.subf %419, %398 : vector<16x64xf32>
    %421 = arith.mulf %420, %398 : vector<16x64xf32>
    %422 = math.exp %421 : vector<16x64xf32>
    %423 = arith.mulf %418, %422 : vector<16x64xf32>
    %cst_194 = arith.constant 1.000000e+00 : f32
    %424 = vector.broadcast %cst_194 : f32 to vector<16x64xf32>
    %425 = arith.subf %424, %423 : vector<16x64xf32>
    %cst_195 = arith.constant 0.000000e+00 : f32
    %426 = vector.broadcast %cst_195 : f32 to vector<16x64xf32>
    %427 = arith.cmpf olt, %397, %426 : vector<16x64xf32>
    %cst_196 = arith.constant 0.000000e+00 : f32
    %428 = vector.broadcast %cst_196 : f32 to vector<16x64xf32>
    %429 = arith.subf %428, %425 : vector<16x64xf32>
    %430 = arith.select %427, %429, %425 : vector<16x64xi1>, vector<16x64xf32>
    %cst_197 = arith.constant 1.000000e+00 : f32
    %431 = vector.broadcast %cst_197 : f32 to vector<16x64xf32>
    %432 = arith.addf %431, %430 : vector<16x64xf32>
    %433 = arith.mulf %395, %432 : vector<16x64xf32>
    %434 = arith.truncf %433 : vector<16x64xf32> to vector<16x64xbf16>
    %c1_198 = arith.constant 1 : index
    %c0_199 = arith.constant 0 : index
    %c0_200 = arith.constant 0 : index
    %435 = vector.load %arg12[%c1_198, %c0_199, %c0_200] : memref<2x64x32xbf16, #tpu.memory_space<vmem>>, vector<1x64x32xbf16>
    %436 = vector.shape_cast %435 : vector<1x64x32xbf16> to vector<64x32xbf16>
    %cst_201 = arith.constant dense<0.000000e+00> : vector<16x32xf32>
    %437 = tpu.matmul %434, %436, %cst_201 {dimension_numbers = #tpu.dot_dimension_numbers<[1], [0], [0], [1], [0, 0, 1, 1], [], []>} : vector<16x64xbf16>, vector<64x32xbf16>, vector<16x32xf32> -> vector<16x32xf32>
    %438 = arith.addf %359, %437 : vector<16x32xf32>
    %c1_202 = arith.constant 1 : index
    %c0_203 = arith.constant 0 : index
    %c0_204 = arith.constant 0 : index
    %439 = vector.load %arg13[%c1_202, %c0_203, %c0_204] : memref<2x1x32xf32, #tpu.memory_space<vmem>>, vector<1x1x32xf32>
    %440 = vector.shape_cast %439 : vector<1x1x32xf32> to vector<1x32xf32>
    %441 = vector.broadcast %440 : vector<1x32xf32> to vector<16x32xf32>
    %442 = arith.addf %438, %441 : vector<16x32xf32>
    %c0_205 = arith.constant 0 : index
    %c0_206 = arith.constant 0 : index
    %443 = vector.load %arg14[%c0_205, %c0_206] : memref<1x32xf32, #tpu.memory_space<vmem>>, vector<1x32xf32>
    %c0_207 = arith.constant 0 : index
    %c0_208 = arith.constant 0 : index
    %444 = vector.load %arg15[%c0_207, %c0_208] : memref<1x32xf32, #tpu.memory_space<vmem>>, vector<1x32xf32>
    %cst_209 = arith.constant dense<0.000000e+00> : vector<16xf32>
    %445 = vector.multi_reduction <add>, %442, %cst_209 [1] : vector<16x32xf32> to vector<16xf32>
    %446 = vector.shape_cast %445 : vector<16xf32> to vector<16x1xf32>
    %cst_210 = arith.constant 3.200000e+01 : f32
    %447 = vector.broadcast %cst_210 : f32 to vector<16x1xf32>
    %448 = arith.divf %446, %447 : vector<16x1xf32>
    %449 = vector.broadcast %448 : vector<16x1xf32> to vector<16x32xf32>
    %450 = arith.subf %442, %449 : vector<16x32xf32>
    %451 = arith.mulf %450, %450 : vector<16x32xf32>
    %cst_211 = arith.constant dense<0.000000e+00> : vector<16xf32>
    %452 = vector.multi_reduction <add>, %451, %cst_211 [1] : vector<16x32xf32> to vector<16xf32>
    %453 = vector.shape_cast %452 : vector<16xf32> to vector<16x1xf32>
    %cst_212 = arith.constant 3.200000e+01 : f32
    %454 = vector.broadcast %cst_212 : f32 to vector<16x1xf32>
    %455 = arith.divf %453, %454 : vector<16x1xf32>
    %456 = vector.broadcast %448 : vector<16x1xf32> to vector<16x32xf32>
    %457 = arith.subf %442, %456 : vector<16x32xf32>
    %cst_213 = arith.constant 9.99999974E-6 : f32
    %458 = vector.broadcast %cst_213 : f32 to vector<16x1xf32>
    %459 = arith.addf %455, %458 : vector<16x1xf32>
    %460 = math.rsqrt %459 : vector<16x1xf32>
    %461 = vector.broadcast %460 : vector<16x1xf32> to vector<16x32xf32>
    %462 = arith.mulf %457, %461 : vector<16x32xf32>
    %463 = vector.broadcast %443 : vector<1x32xf32> to vector<16x32xf32>
    %464 = arith.mulf %462, %463 : vector<16x32xf32>
    %465 = vector.broadcast %444 : vector<1x32xf32> to vector<16x32xf32>
    %466 = arith.addf %464, %465 : vector<16x32xf32>
    %c0_214 = arith.constant 0 : index
    %c0_215 = arith.constant 0 : index
    %467 = vector.load %arg16[%c0_214, %c0_215] : memref<16x32xf32, #tpu.memory_space<vmem>>, vector<16x32xf32>
    tpu.vector_store %arg16[%c0_214, %c0_215], %466 {strides = array<i32>} : memref<16x32xf32, #tpu.memory_space<vmem>>, vector<16x32xf32>,
    return
  }
}

</mosaic_0001>

<bundles_post_ra>
// kernel: transformer_forward.1
= control target key start
LH: loop header
LB: loop body
LE: loop exit
PB: predicated region body
PF: predicated region fallthrough
CT: control target
= control target key end

     0   :  { %s3967_s0 = inlined_call_operand.vmem [shape: f32[16,32], index: 0, kind: input, shape index: {}]   ;;  %s3968_s1 = inlined_call_operand.vmem [shape: f32[2,1,32], index: 1, kind: input, shape index: {}]   ;;  %s3969_s2 = inlined_call_operand.vmem [shape: f32[2,1,32], index: 2, kind: input, shape index: {}]   ;;  %s3970_s3 = inlined_call_operand.vmem [shape: bf16[2,32,64], index: 3, kind: input, shape index: {}]   ;;  %s3971_s4 = inlined_call_operand.hbm [shape: bf16[2,32,64], index: 4, kind: input, shape index: {}]   ;;  %s3972_s5 = inlined_call_operand.hbm [shape: bf16[2,32,64], index: 5, kind: input, shape index: {}]   ;;  %s3973_s6 = inlined_call_operand.vmem [shape: bf16[2,4,16,32], index: 6, kind: input, shape index: {}]   ;;  %s3974_s7 = inlined_call_operand.vmem [shape: f32[2,1,32], index: 7, kind: input, shape index: {}]   ;;  %s3975_s8 = inlined_call_operand.vmem [shape: f32[2,1,32], index: 8, kind: input, shape index: {}]   ;;  %s3976_s9 = inlined_call_operand.hbm [shape: f32[2,1,32], index: 9, kind: input, shape index: {}]   ;;  %s3977_s10 = inlined_call_operand.hbm [shape: bf16[2,32,64], index: 10, kind: input, shape index: {}]   ;;  %s3978_s11 = inlined_call_operand.hbm [shape: f32[2,1,64], index: 11, kind: input, shape index: {}]   ;;  %s3979_s12 = inlined_call_operand.vmem [shape: bf16[2,64,32], index: 12, kind: input, shape index: {}]   ;;  %s3980_s13 = inlined_call_operand.hbm [shape: f32[2,1,32], index: 13, kind: input, shape index: {}]   ;;  %s3981_s14 = inlined_call_operand.vmem [shape: f32[1,32], index: 14, kind: input, shape index: {}]   ;;  %s3982_s15 = inlined_call_operand.hbm [shape: f32[1,32], index: 15, kind: input, shape index: {}]   ;;  %s3983_s16 = inlined_call_operand.hbm [shape: f32[16,32], index: 16, kind: output, shape index: {}]  }
   0x1   :  { %3985 = sst [smem:[#allocation20_spill]] %s3967_s0 }
   0x2   :  { %21 = vsyncpa [#allocation3], 0 }
   0x3   :  { %22 = vsyncpa [#allocation6], 0 }
   0x4   :  { %23 = vsyncpa [#allocation9], 0 }
   0x5   :  { %24 = vsyncpa [#allocation12], 0 }
   0x6   :  { %25 = vsyncpa [#allocation4], 0  ;;  %s3383_s21 = smov [#allocation5]   ;;  %s3384_s23 = smov [#allocation8]  }
   0x7   :  { %s51_s22 = sshll.u32 %s3383_s21, 4  ;;  %s81_s24 = sshll.u32 %s3384_s23, 4  ;;  %s52_s22 = int_to_ptr.vmem [resolvable:$true] %s51_s22  ;;  %s82_s24 = int_to_ptr.vmem [resolvable:$true] %s81_s24 }
   0x8   :  { %s3221_s25 = scalar_lea.vmem %s52_s22, 512  ;;  %p3226_p1 = scmp.lt.s32.totalorder %s52_s22, %s52_s22 }
   0x9   :  { %p3222_p0 = scmp.ne.s32.totalorder %s52_s22, %s3221_s25  ;;  %p3227_p2 = scmp.lt.s32.totalorder %s3221_s25, %s3221_s25 }
   0xb   :  { %p3228_p3 = por %p3227_p2, %p3226_p1 }
   0xd   :  { %p3229_p4 = pnand %p3228_p3, %p3222_p0 }
   0xf   :  { %3232 = shalt.err (!%p3229_p4)
}
  0x10   :  { %s3385_s26 = smov 64   ;;  %s3386_s27 = smov 4  }
  0x11   :  { %57 = dma.hbm_to_vmem [thread:$0]  %s3972_s5, 512, %s52_s22, [#allocation6], %s3385_s26, %s3385_s26, %s3386_s27  }
  0x12   :  { %s3241_s30 = scalar_lea.vmem %s82_s24, 512  ;;  %p3246_p6 = scmp.lt.s32.totalorder %s82_s24, %s82_s24 }
  0x13   :  { %p3242_p5 = scmp.ne.s32.totalorder %s82_s24, %s3241_s30  ;;  %p3247_p7 = scmp.lt.s32.totalorder %s3241_s30, %s3241_s30 }
  0x15   :  { %p3248_p8 = por %p3247_p7, %p3246_p6 }
  0x17   :  { %p3249_p9 = pnand %p3248_p8, %p3242_p5 }
  0x19   :  { %3252 = shalt.err (!%p3249_p9)
}
  0x1a   :  { %87 = dma.hbm_to_vmem [thread:$0]  %s3977_s10, 512, %s82_s24, [#allocation9], %s3385_s26, %s3385_s26, %s3386_s27  }
  0x1b   :  { %s3387_s18 = smov [#allocation11]   ;;  %s3388_s20 = smov [#allocation2]  }
  0x1c   :  { %s107_s19 = sshll.u32 %s3387_s18, 4  ;;  %s39_s21 = sshll.u32 %s3388_s20, 4  ;;  %s108_s19 = int_to_ptr.vmem [resolvable:$true] %s107_s19  ;;  %s40_s21 = int_to_ptr.vmem [resolvable:$true] %s39_s21 }
  0x1d   :  { %s3261_s5 = scalar_lea.vmem %s108_s19, 32  ;;  %p3266_p11 = scmp.lt.s32.totalorder %s108_s19, %s108_s19 }
  0x1e   :  { %p3262_p10 = scmp.ne.s32.totalorder %s108_s19, %s3261_s5  ;;  %p3267_p12 = scmp.lt.s32.totalorder %s3261_s5, %s3261_s5 }
  0x20   :  { %p3268_p13 = por %p3267_p12, %p3266_p11 }
  0x22   :  { %p3269_p0 = pnand %p3268_p13, %p3262_p10 }
  0x24   :  { %3272 = shalt.err (!%p3269_p0)
}
  0x25   :  { %s3389_s22 = smov 16   ;;  %s3390_s23 = smov 1  }
  0x26   :  { %113 = dma.hbm_to_vmem [thread:$0]  %s3980_s13, 32, %s108_s19, [#allocation12], %s3389_s22, %s3389_s22, %s3390_s23  }
  0x27   :  { %s3281_s24 = scalar_lea.vmem %s40_s21, 512  ;;  %p3286_p2 = scmp.lt.s32.totalorder %s40_s21, %s40_s21 }
  0x28   :  { %p3282_p1 = scmp.ne.s32.totalorder %s40_s21, %s3281_s24  ;;  %p3287_p3 = scmp.lt.s32.totalorder %s3281_s24, %s3281_s24 }
  0x2a   :  { %p3288_p4 = por %p3287_p3, %p3286_p2 }
  0x2c   :  { %p3289_p5 = pnand %p3288_p4, %p3282_p1 }
  0x2e   :  { %3292 = shalt.err (!%p3289_p5)
}
  0x2f   :  { %45 = dma.hbm_to_vmem [thread:$0]  %s3971_s4, 512, %s40_s21, [#allocation3], %s3385_s26, %s3385_s26, %s3386_s27  }
  0x30   :  { %s3391_s30 = smov [#allocation7]   ;;  %s3392_s17 = smov [#allocation10]  }
  0x31   :  { %s69_s0 = sshll.u32 %s3391_s30, 4  ;;  %s93_s18 = sshll.u32 %s3392_s17, 4  ;;  %s70_s0 = int_to_ptr.vmem [resolvable:$true] %s69_s0  ;;  %s94_s18 = int_to_ptr.vmem [resolvable:$true] %s93_s18 }
  0x32   :  { %s3301_s13 = scalar_lea.vmem %s70_s0, 32  ;;  %p3306_p7 = scmp.lt.s32.totalorder %s70_s0, %s70_s0 }
  0x33   :  { %p3302_p6 = scmp.ne.s32.totalorder %s70_s0, %s3301_s13  ;;  %p3307_p8 = scmp.lt.s32.totalorder %s3301_s13, %s3301_s13 }
  0x35   :  { %p3308_p9 = por %p3307_p8, %p3306_p7 }
  0x37   :  { %p3309_p10 = pnand %p3308_p9, %p3302_p6 }
  0x39   :  { %3312 = shalt.err (!%p3309_p10)
}
  0x3a   :  { %75 = dma.hbm_to_vmem [thread:$0]  %s3976_s9, 32, %s70_s0, [#allocation6], %s3389_s22, %s3389_s22, %s3390_s23  }
  0x3b   :  { %s3321_s4 = scalar_lea.vmem %s94_s18, 32  ;;  %p3326_p12 = scmp.lt.s32.totalorder %s94_s18, %s94_s18 }
  0x3c   :  { %p3322_p11 = scmp.ne.s32.totalorder %s94_s18, %s3321_s4  ;;  %p3327_p13 = scmp.lt.s32.totalorder %s3321_s4, %s3321_s4 }
  0x3e   :  { %p3328_p0 = por %p3327_p13, %p3326_p12 }
  0x40   :  { %p3329_p1 = pnand %p3328_p0, %p3322_p11 }
  0x42   :  { %3332 = shalt.err (!%p3329_p1)
}
  0x43   :  { %99 = dma.hbm_to_vmem [thread:$0]  %s3978_s11, 32, %s94_s18, [#allocation9], %s3389_s22, %s3389_s22, %s3390_s23  }
  0x44   :  { %s3393_s21 = smov [#allocation13]  }
  0x45   :  { %s122_s5 = sshll.u32 %s3393_s21, 4  ;;  %s123_s5 = int_to_ptr.vmem [resolvable:$true] %s122_s5 }
  0x46   :  { %s3341_s25 = scalar_lea.vmem %s123_s5, 16  ;;  %s3345_s9 = scalar_lea.vmem %s123_s5, 32 }
  0x47   :  { %p3342_p2 = scmp.ne.s32.totalorder %s123_s5, %s3341_s25  ;;  %p3346_p3 = scmp.lt.s32.totalorder %s123_s5, %s123_s5 }
  0x48   :  { %p3347_p4 = scmp.lt.s32.totalorder %s3345_s9, %s3341_s25 }
  0x4a   :  { %p3348_p5 = por %p3347_p4, %p3346_p3 }
  0x4c   :  { %p3349_p6 = pnand %p3348_p5, %p3342_p2 }
  0x4e   :  { %3352 = shalt.err (!%p3349_p6)
}
  0x4f   :  { %125 = dma.hbm_to_vmem [thread:$0]  %s3982_s15, 16, %s123_s5, [#allocation12]  }
  0x50   :  { %3373 = dma.done.wait [#allocation3], 512  }
  0x51   :  { %3374 = vsyncadd [#allocation3], 4294966784 }
  0x52   :  { %3375 = dma.done.wait [#allocation6], 544  }
  0x53   :  { %3376 = vsyncadd [#allocation6], 4294966752 }
  0x54   :  { %3377 = dma.done.wait [#allocation9], 544  }
  0x55   :  { %3378 = vsyncadd [#allocation9], 4294966752 }
  0x56   :  { %3379 = dma.done.wait [#allocation12], 48  }
  0x57   :  { %3380 = vsyncadd [#allocation12], 4294967248  ;;  %vm170_vm0 = vcmask 261120   ;;  %s3986_s23 = sld [smem:[#allocation20_spill]]  ;;  %v3081_v14 = vld [vmem:[%s3970_s3 + $0x8] sm:$0xff]   ;;  %v3394_v16 = vmov 0.0   ;;  %v150_v54 = vlaneseq }
  0x58   :  { %v3082_v15 = vld [vmem:[#allocation5 + $0x8] sm:$0xff]   ;;  %2829 = vmatprep.subr.bf16.mxu1 %v3394_v16  ;;  %2845 = vmatprep.subr.bf16.mxu0 %v3394_v16  ;;  %v3083_v17 = vld [vmem:[%s3970_s3] sm:$0xff]   ;;  %vm3395_vm1 = vmmov 0   ;;  %vm401_vm2 = vcmask 130048   ;;  %s3397_s4 = smov 112   ;;  %s3398_s21 = smov 96  }
  0x59   :  { %2830 = vmatpush3.bf16.msra.mxu1 %v3081_v14  ;;  %2846 = vmatpush3.bf16.msra.mxu0 %v3082_v15  ;;  %v3084_v18 = vld [vmem:[#allocation5] sm:$0xff]   ;;  %v3085_v35 = vld [vmem:[#allocation2 + $0x8] sm:$0xff]   ;;  %v151_v55 = vshrl.u32 %v150_v54, 7  ;;  %v156_v56 = vand.u32 127, %v150_v54  ;;  %s3399_s9 = smov 80   ;;  %vm1304_vm7 = vcmask 523264  }
  0x5a   :  { %2831 = vmatprep.subr.bf16.mxu1 %v3394_v16  ;;  %2847 = vmatprep.subr.bf16.mxu0 %v3394_v16  ;;  %v2627_v27 = vld [vmem:[%s3968_s1] ss:$0 sm:$0xff]  ;;  %s3400_s5 = smov [#allocation14]  }
  0x5b   :  { %2833 = vmatprep.mubr.msk.bf16.mxu1 %vm3395_vm1, %v3394_v16  ;;  %2849 = vmatprep.mubr.msk.bf16.mxu0 %vm3395_vm1, %v3394_v16  ;;  %v2628_v31 = vld [vmem:[%s3969_s2] ss:$0 sm:$0xff]  ;;  %v153_v57 = vcvt.s32.f32 %v151_v55  ;;  %v157_v58 = vcvt.s32.f32 %v156_v56  ;;  %v152_v59 = vadd.s32 8, %v151_v55  ;;  %s2612_s25 = sshll.u32 %s3400_s5, 4  ;;  %s2613_s25 = int_to_ptr.vmem [resolvable:$true] %s2612_s25 }
  0x5c   :  { %v3086_v37 = vld [vmem:[#allocation2] sm:$0xff]   ;;  %s3353_s10 = scalar_lea.vmem %s2613_s25, 256  ;;  %p3358_p8 = scmp.lt.s32.totalorder %s2613_s25, %s2613_s25 }
  0x5d   :  { %v3530_v0 = vld [vmem:[%s3986_s23] sm:$0xff]  ;;  %v3535_v1 = vld [vmem:[%s3986_s23 + $0x8] sm:$0xff]  ;;  %2832 = vmatpush3.bf16.msra.mxu1 %v3083_v17  ;;  %2848 = vmatpush3.bf16.msra.mxu0 %v3084_v18  ;;  %v158_v60 = vmul.f32 0.125, %v153_v57  ;;  %v162_v61 = vmul.f32 0.125, %v157_v58  ;;  %v154_v62 = vcvt.s32.f32 %v152_v59  ;;  %p3354_p7 = scmp.ne.s32.totalorder %s2613_s25, %s3353_s10  ;;  %p3359_p9 = scmp.lt.s32.totalorder %s3353_s10, %s3353_s10 }
  0x5e   :  { %v171_v2 = vsel %vm170_vm0, %v3530_v0, 0.0  ;;  %v174_v3 = vsel %vm170_vm0, %v3535_v1, 0.0  ;;  %2837 = vmatprep.subr.bf16.mxu1 %v3394_v16  ;;  %2859 = vmatprep.subr.bf16.mxu0 %v3394_v16 }
  0x5f   :  { %172 = vadd.xlane.f32.xlu0 %v171_v2  ;;  %v160_v63 = vfloor.f32 %v158_v60  ;;  %v163_v2 = vfloor.f32 %v162_v61  ;;  %p3360_p10 = por %p3359_p9, %p3358_p8 }
  0x61   :  { %vm164_vm3 = vcmp.eq.f32.partialorder %v160_v63, %v163_v2  ;;  %p3361_p11 = pnand %p3360_p10, %p3354_p7 }
  0x63   :  { %175 = vadd.xlane.f32.xlu0 %v174_v3  ;;  %v159_v3 = vmul.f32 0.125, %v154_v62 }
  0xe8   :  { %v173_v4 = vpop.xlane.xlu0 %172 }
  0xe9   :  { %v178_v5 = vmul.f32 0.03125, %v173_v4  ;;  %v161_v4 = vfloor.f32 %v159_v3 }
  0xeb   :  { %v180_v6 = vsub.f32 %v3530_v0, %v178_v5  ;;  %v3396_v5 = vmov -1e+30   ;;  %vm165_vm4 = vcmp.eq.f32.partialorder %v161_v4, %v163_v2 }
  0xec   :  { %v176_v7 = vpop.xlane.xlu0 %175 }
  0xed   :  { %v179_v8 = vmul.f32 0.03125, %v176_v7  ;;  %v182_v9 = vmul.f32 %v180_v6, %v180_v6 }
  0xef   :  { %v181_v10 = vsub.f32 %v3535_v1, %v179_v8  ;;  %v184_v11 = vsel %vm170_vm0, %v182_v9, 0.0 }
  0xf0   :  { %185 = vadd.xlane.f32.xlu1 %v184_v11 }
  0xf1   :  { %v183_v12 = vmul.f32 %v181_v10, %v181_v10 }
  0xf3   :  { %v187_v13 = vsel %vm170_vm0, %v183_v12, 0.0 }
  0xf4   :  { %188 = vadd.xlane.f32.xlu1 %v187_v13 }
 0x179   :  { %v186_v19 = vpop.xlane.xlu1 %185 }
 0x17a   :  { %v190_v20 = vmul.f32 0.03125, %v186_v19 }
 0x17c   :  { %v192_v21 = vadd.f32 1e-05, %v190_v20 }
 0x17d   :  { %v189_v22 = vpop.xlane.xlu1 %188 }
 0x17e   :  { %3113 = vrsqrt.f32 %v192_v21  ;;  %v191_v23 = vmul.f32 0.03125, %v189_v22 }
 0x180   :  { %v193_v24 = vadd.f32 1e-05, %v191_v23 }
 0x182   :  { %3115 = vrsqrt.f32 %v193_v24 }
 0x18b   :  { %v3114_v25 = vpop.eup %3113 }
 0x18c   :  { %v196_v26 = vmul.f32 %v3114_v25, %v180_v6  ;;  %v3593_v6 = vsel %vm164_vm3, 0.0, %v3396_v5 }
 0x18e   :  { %v204_v30 = vmul.f32 %v2627_v27, %v196_v26 }
 0x18f   :  { %v3116_v28 = vpop.eup %3115 }
 0x190   :  { %v197_v29 = vmul.f32 %v3116_v28, %v181_v10  ;;  %v212_v33 = vadd.f32 %v2628_v31, %v204_v30  ;;  %v3596_v10 = vsel %vm165_vm4, 0.0, %v3396_v5 }
 0x192   :  { %v205_v32 = vmul.f32 %v2627_v27, %v197_v29 }
 0x194   :  { %v213_v34 = vadd.f32 %v2628_v31, %v205_v32 }
 0x196   :  { %v214_v36 = vpack.c.bf16 %v213_v34, %v212_v33 }
 0x198   :  { %2834 = vmatmul.mubr.msk.bf16.vlgmr.msra.gmra.mxu1 %vm170_vm0, %v214_v36  ;;  %2850 = vmatmul.mubr.msk.bf16.vlgmr.msra.gmra.mxu0 %vm170_vm0, %v214_v36 }
 0x199   :  { %2838 = vmatpush3.bf16.msra.mxu1 %v3085_v35  ;;  %2841 = vmatprep.mubr.msk.bf16.mxu1 %vm3395_vm1, %v3394_v16 }
 0x19a   :  { %2839 = vmatprep.subr.bf16.mxu1 %v3394_v16  ;;  %2861 = vmatprep.mubr.msk.bf16.mxu0 %vm3395_vm1, %v3394_v16 }
 0x19d   :  { %2840 = vmatpush3.bf16.msra.mxu1 %v3086_v37  ;;  %v3087_v37 = vld [vmem:[%s3973_s6] sm:$0xff]  }
 0x19e   :  { %2853 = vmatprep.subr.bf16.mxu1 %v3394_v16 }
 0x1a0   :  { %2842 = vmatmul.mubr.msk.bf16.vlgmr.msra.gmra.mxu1 %vm170_vm0, %v214_v36 }
 0x1a1   :  { %2855 = vmatprep.mubr.msk.bf16.mxu1 %vm3395_vm1, %v3394_v16 }
 0x258   :  { %v268_v38 = vpop.f32.mrf.mxu1  ;;  %v384_v39 = vpop.f32.mrf.mxu0 }
 0x25a   :  { %v2835_v40 = vpop.f32.mrf.mxu1  ;;  %v2851_v41 = vpop.f32.mrf.mxu0 }
 0x25c   :  { %v271_v42 = vpop.f32.mrf.mxu1  ;;  %v387_v43 = vpop.f32.mrf.mxu0 }
 0x25d   :  { %v3578_v44 = vpack.c.bf16 %v387_v43, %v384_v39  ;;  %v3587_v53 = vpack.c.bf16 %v271_v42, %v268_v38 }
 0x25e   :  { %v2836_v45 = vpop.f32.mrf.mxu1  ;;  %v2852_v46 = vpop.f32.mrf.mxu0 }
 0x25f   :  { %2860 = vmatpush3.bf16.msra.mxu0 %v3578_v44 }
 0x260   :  { %v326_v47 = vpop.f32.mrf.mxu1  ;;  %2871 = vmatprep.subr.bf16.mxu0 %v3394_v16 }
 0x262   :  { %v2843_v48 = vpop.f32.mrf.mxu1 }
 0x264   :  { %v329_v49 = vpop.f32.mrf.mxu1 }
 0x265   :  { %v3582_v50 = vpack.c.bf16 %v329_v49, %v326_v47 }
 0x266   :  { %v2844_v51 = vpop.f32.mrf.mxu1 }
 0x267   :  { %v406_v52 = vsel %vm401_vm2, %v3582_v50, 0 }
 0x268   :  { %2854 = vmatpush3.bf16.xpose.msra.mxu1 %v406_v52 }
 0x269   :  { %2865 = vmatprep.subr.bf16.mxu1 %v3394_v16 }
 0x26f   :  { %2856 = vmatmul.mubr.msk.bf16.vlgmr.msra.gmra.mxu1 %vm401_vm2, %v3587_v53 }
 0x270   :  { %2867 = vmatprep.mubr.msk.bf16.mxu1 %vm3395_vm1, %v3394_v16  ;;  %2866 = vmatpush3.bf16.msra.mxu1 %v3087_v37 }
 0x271   :  { %2877 = vmatprep.subr.bf16.mxu1 %v3394_v16 }
 0x32f   :  { %v442_v7 = vpop.f32.mrf.mxu1 }
 0x330   :  { %v443_v8 = vadd.f32 %v442_v7, %v3593_v6 }
 0x331   :  { %v2857_v9 = vpop.f32.mrf.mxu1 }
 0x332   :  { %v449_v11 = vsel %vm401_vm2, %v443_v8, -inf }
 0x333   :  { %450 = vmax.xlane.f32.xlu0 %v449_v11  ;;  %v445_v12 = vpop.f32.mrf.mxu1 }
 0x334   :  { %v446_v13 = vadd.f32 %v445_v12, %v3596_v10 }
 0x335   :  { %v2858_v14 = vpop.f32.mrf.mxu1 }
 0x336   :  { %v452_v15 = vsel %vm401_vm2, %v446_v13, -inf }
 0x337   :  { %453 = vmax.xlane.f32.xlu1 %v452_v15 }
 0x3bc   :  { %v451_v17 = vpop.xlane.xlu0 %450 }
 0x3bd   :  { %v455_v18 = vsub.f32 %v443_v8, %v451_v17 }
 0x3bf   :  { %v457_v19 = vmul.f32 1.442695, %v455_v18 }
 0x3c0   :  { %v454_v20 = vpop.xlane.xlu1 %453 }
 0x3c1   :  { %3117 = vpow2.f32 %v457_v19  ;;  %v456_v21 = vsub.f32 %v446_v13, %v454_v20  ;;  %v3088_v20 = vld [vmem:[%s3973_s6 + $0x8] sm:$0xff]  }
 0x3c3   :  { %v459_v22 = vmul.f32 1.442695, %v456_v21 }
 0x3c5   :  { %3119 = vpow2.f32 %v459_v22 }
 0x3ce   :  { %v3118_v23 = vpop.eup %3117 }
 0x3cf   :  { %v461_v24 = vsel %vm401_vm2, %v3118_v23, 0.0 }
 0x3d0   :  { %462 = vadd.xlane.f32.xlu0 %v461_v24 }
 0x3d2   :  { %v3120_v25 = vpop.eup %3119 }
 0x3d3   :  { %v464_v26 = vsel %vm401_vm2, %v3120_v25, 0.0 }
 0x3d4   :  { %465 = vadd.xlane.f32.xlu1 %v464_v26 }
 0x3e5   :  { %572 = vrot.lane.b32.xlu1 %v3587_v53, %s3397_s4 }
 0x3e6   :  { %575 = vrot.lane.b32.xlu0 %v3582_v50, %s3397_s4 }
 0x459   :  { %v463_v27 = vpop.xlane.xlu0 %462 }
 0x45a   :  { %3121 = vrcp.f32 %v463_v27 }
 0x45d   :  { %v466_v28 = vpop.xlane.xlu1 %465  ;;  %v576_v33 = vpop.permute.xlu0 %575 }
 0x45e   :  { %3123 = vrcp.f32 %v466_v28  ;;  %v581_v35 = vsel %vm401_vm2, %v576_v33, 0 }
 0x461   :  { %v573_v36 = vpop.permute.xlu1 %572 }
 0x467   :  { %v3122_v29 = vpop.eup %3121 }
 0x468   :  { %v469_v31 = vmul.f32 %v3122_v29, %v3118_v23 }
 0x46b   :  { %v3124_v30 = vpop.eup %3123 }
 0x46c   :  { %v470_v32 = vmul.f32 %v3124_v30, %v3120_v25 }
 0x46e   :  { %v471_v34 = vpack.c.bf16 %v470_v32, %v469_v31 }
 0x470   :  { %2862 = vmatmul.mubr.msk.bf16.vlgmr.msra.gmra.mxu0 %vm401_vm2, %v471_v34 }
 0x471   :  { %2872 = vmatpush3.bf16.xpose.msra.mxu0 %v581_v35  ;;  %2873 = vmatprep.mubr.msk.bf16.mxu0 %vm3395_vm1, %v3394_v16 }
 0x472   :  { %2883 = vmatprep.subr.bf16.mxu0 %v3394_v16 }
 0x478   :  { %2874 = vmatmul.mubr.msk.bf16.vlgmr.msra.gmra.mxu0 %vm401_vm2, %v573_v36 }
 0x479   :  { %2885 = vmatprep.mubr.msk.bf16.mxu0 %vm3395_vm1, %v3394_v16  ;;  %2884 = vmatpush3.bf16.msra.mxu0 %v3088_v20 }
 0x47a   :  { %2895 = vmatprep.subr.bf16.mxu0 %v3394_v16 }
 0x530   :  { %v509_v38 = vpop.f32.mrf.mxu0 }
 0x532   :  { %v2863_v39 = vpop.f32.mrf.mxu0 }
 0x534   :  { %v512_v40 = vpop.f32.mrf.mxu0 }
 0x535   :  { %v516_v41 = vpack.c.bf16 %v512_v40, %v509_v38 }
 0x536   :  { %v2864_v42 = vpop.f32.mrf.mxu0 }
 0x537   :  { %2868 = vmatmul.mubr.msk.bf16.vlgmr.msra.gmra.mxu1 %vm401_vm2, %v516_v41 }
 0x538   :  { %v617_v43 = vpop.f32.mrf.mxu0  ;;  %2879 = vmatprep.mubr.msk.bf16.mxu1 %vm3395_vm1, %v3394_v16 }
 0x539   :  { %v618_v45 = vadd.f32 %v617_v43, %v3593_v6 }
 0x53a   :  { %v2875_v46 = vpop.f32.mrf.mxu0 }
 0x53b   :  { %v624_v47 = vsel %vm401_vm2, %v618_v45, -inf }
 0x53c   :  { %625 = vmax.xlane.f32.xlu1 %v624_v47  ;;  %v620_v48 = vpop.f32.mrf.mxu0 }
 0x53d   :  { %v621_v49 = vadd.f32 %v620_v48, %v3596_v10 }
 0x53e   :  { %v2876_v51 = vpop.f32.mrf.mxu0 }
 0x53f   :  { %v627_v52 = vsel %vm401_vm2, %v621_v49, -inf }
 0x540   :  { %628 = vmax.xlane.f32.xlu0 %v627_v52 }
 0x5c5   :  { %v626_v54 = vpop.xlane.xlu1 %625 }
 0x5c6   :  { %v630_v55 = vsub.f32 %v618_v45, %v626_v54 }
 0x5c8   :  { %v632_v56 = vmul.f32 1.442695, %v630_v55 }
 0x5c9   :  { %v629_v57 = vpop.xlane.xlu0 %628 }
 0x5ca   :  { %3125 = vpow2.f32 %v632_v56  ;;  %v631_v58 = vsub.f32 %v621_v49, %v629_v57 }
 0x5cc   :  { %v634_v59 = vmul.f32 1.442695, %v631_v58 }
 0x5ce   :  { %3127 = vpow2.f32 %v634_v59 }
 0x5d7   :  { %v3126_v60 = vpop.eup %3125 }
 0x5d8   :  { %v636_v61 = vsel %vm401_vm2, %v3126_v60, 0.0 }
 0x5d9   :  { %637 = vadd.xlane.f32.xlu0 %v636_v61 }
 0x5db   :  { %v3128_v62 = vpop.eup %3127 }
 0x5dc   :  { %v639_v63 = vsel %vm401_vm2, %v3128_v62, 0.0 }
 0x5dd   :  { %640 = vadd.xlane.f32.xlu1 %v639_v63 }
 0x5ee   :  { %753 = vrot.lane.b32.xlu1 %v3582_v50, %s3398_s21 }
 0x5ef   :  { %648 = vrot.lane.b32.xlu0 %v3578_v44, %s3397_s4 }
 0x5f2   :  { %751 = vrot.lane.b32.xlu1 %v3587_v53, %s3398_s21 }
 0x5f7   :  { %v3634_v2 = vpop.f32.mrf.mxu1 }
 0x5f9   :  { %v2869_v3 = vpop.f32.mrf.mxu1 }
 0x5fa   :  { %v3089_v3 = vld [vmem:[%s3973_s6 + $0x10] sm:$0xff]  }
 0x5fb   :  { %v3636_v4 = vpop.f32.mrf.mxu1 }
 0x5fd   :  { %v2870_v5 = vpop.f32.mrf.mxu1 }
 0x662   :  { %v638_v7 = vpop.xlane.xlu0 %637 }
 0x663   :  { %3129 = vrcp.f32 %v638_v7 }
 0x666   :  { %v641_v8 = vpop.xlane.xlu1 %640  ;;  %v649_v9 = vpop.permute.xlu0 %648 }
 0x667   :  { %3131 = vrcp.f32 %v641_v8  ;;  %2878 = vmatpush3.bf16.msra.mxu1 %v649_v9 }
 0x668   :  { %2889 = vmatprep.subr.bf16.mxu1 %v3394_v16 }
 0x66a   :  { %v754_v15 = vpop.permute.xlu1 %753 }
 0x66b   :  { %v759_v18 = vsel %vm401_vm2, %v754_v15, 0 }
 0x66e   :  { %v752_v19 = vpop.permute.xlu1 %751 }
 0x670   :  { %v3130_v11 = vpop.eup %3129 }
 0x671   :  { %v644_v13 = vmul.f32 %v3130_v11, %v3126_v60 }
 0x674   :  { %v3132_v12 = vpop.eup %3131 }
 0x675   :  { %v645_v14 = vmul.f32 %v3132_v12, %v3128_v62 }
 0x677   :  { %v646_v17 = vpack.c.bf16 %v645_v14, %v644_v13 }
 0x679   :  { %2880 = vmatmul.mubr.msk.bf16.vlgmr.msra.gmra.mxu1 %vm401_vm2, %v646_v17 }
 0x67a   :  { %2890 = vmatpush3.bf16.xpose.msra.mxu1 %v759_v18  ;;  %2891 = vmatprep.mubr.msk.bf16.mxu1 %vm3395_vm1, %v3394_v16 }
 0x67b   :  { %2901 = vmatprep.subr.bf16.mxu1 %v3394_v16 }
 0x681   :  { %2892 = vmatmul.mubr.msk.bf16.vlgmr.msra.gmra.mxu1 %vm401_vm2, %v752_v19 }
 0x682   :  { %2903 = vmatprep.mubr.msk.bf16.mxu1 %vm3395_vm1, %v3394_v16  ;;  %2902 = vmatpush3.bf16.msra.mxu1 %v3089_v3 }
 0x683   :  { %2913 = vmatprep.subr.bf16.mxu1 %v3394_v16 }
 0x739   :  { %v688_v21 = vpop.f32.mrf.mxu1 }
 0x73b   :  { %v2881_v22 = vpop.f32.mrf.mxu1 }
 0x73d   :  { %v691_v23 = vpop.f32.mrf.mxu1 }
 0x73e   :  { %v695_v24 = vpack.c.bf16 %v691_v23, %v688_v21 }
 0x73f   :  { %v2882_v25 = vpop.f32.mrf.mxu1 }
 0x740   :  { %2886 = vmatmul.mubr.msk.bf16.vlgmr.msra.gmra.mxu0 %vm401_vm2, %v695_v24 }
 0x741   :  { %v795_v26 = vpop.f32.mrf.mxu1  ;;  %2897 = vmatprep.mubr.msk.bf16.mxu0 %vm3395_vm1, %v3394_v16 }
 0x742   :  { %v796_v27 = vadd.f32 %v795_v26, %v3593_v6 }
 0x743   :  { %v2893_v28 = vpop.f32.mrf.mxu1 }
 0x744   :  { %v802_v29 = vsel %vm401_vm2, %v796_v27, -inf }
 0x745   :  { %803 = vmax.xlane.f32.xlu1 %v802_v29  ;;  %v798_v30 = vpop.f32.mrf.mxu1 }
 0x746   :  { %v799_v31 = vadd.f32 %v798_v30, %v3596_v10 }
 0x747   :  { %v2894_v32 = vpop.f32.mrf.mxu1 }
 0x748   :  { %v805_v33 = vsel %vm401_vm2, %v799_v31, -inf }
 0x749   :  { %806 = vmax.xlane.f32.xlu0 %v805_v33 }
 0x756   :  { %825 = vrot.lane.b32.xlu1 %v3578_v44, %s3398_s21 }
 0x75a   :  { %928 = vrot.lane.b32.xlu1 %v3587_v53, %s3399_s9  ;;  %v2638_v53 = vld [vmem:[%s3974_s7] ss:$0 sm:$0xff] }
 0x75b   :  { %v399_v46 = vadd.f32 %v2638_v53, %v3530_v0  ;;  %v400_v48 = vadd.f32 %v2638_v53, %v3535_v1 }
 0x75d   :  { %v569_v47 = vadd.f32 %v3634_v2, %v399_v46  ;;  %v570_v54 = vadd.f32 %v3636_v4, %v400_v48 }
 0x7ce   :  { %v804_v34 = vpop.xlane.xlu1 %803 }
 0x7cf   :  { %v808_v35 = vsub.f32 %v796_v27, %v804_v34 }
 0x7d1   :  { %v810_v36 = vmul.f32 1.442695, %v808_v35 }
 0x7d2   :  { %v826_v37 = vpop.permute.xlu1 %825  ;;  %v807_v38 = vpop.xlane.xlu0 %806 }
 0x7d3   :  { %3133 = vpow2.f32 %v810_v36  ;;  %v809_v39 = vsub.f32 %v799_v31, %v807_v38  ;;  %2896 = vmatpush3.bf16.msra.mxu0 %v826_v37 }
 0x7d4   :  { %2907 = vmatprep.subr.bf16.mxu0 %v3394_v16 }
 0x7d5   :  { %v812_v40 = vmul.f32 1.442695, %v809_v39 }
 0x7d6   :  { %v929_v2 = vpop.permute.xlu1 %928 }
 0x7d7   :  { %3135 = vpow2.f32 %v812_v40 }
 0x7e0   :  { %v3134_v41 = vpop.eup %3133 }
 0x7e1   :  { %v814_v42 = vsel %vm401_vm2, %v3134_v41, 0.0 }
 0x7e2   :  { %815 = vadd.xlane.f32.xlu0 %v814_v42 }
 0x7e4   :  { %v3136_v43 = vpop.eup %3135 }
 0x7e5   :  { %v817_v45 = vsel %vm401_vm2, %v3136_v43, 0.0 }
 0x7e6   :  { %818 = vadd.xlane.f32.xlu0 %v817_v45 }
 0x7fc   :  { %930 = vrot.lane.b32.xlu0 %v3582_v50, %s3399_s9 }
 0x800   :  { %v742_v49 = vpop.f32.mrf.mxu0 }
 0x801   :  { %v749_v51 = vadd.f32 %v742_v49, %v569_v47 }
 0x802   :  { %v2887_v52 = vpop.f32.mrf.mxu0 }
 0x804   :  { %v745_v55 = vpop.f32.mrf.mxu0 }
 0x805   :  { %v750_v56 = vadd.f32 %v745_v55, %v570_v54 }
 0x806   :  { %v2888_v57 = vpop.f32.mrf.mxu0 }
 0x86b   :  { %v816_v58 = vpop.xlane.xlu0 %815 }
 0x86c   :  { %3137 = vrcp.f32 %v816_v58 }
 0x86f   :  { %v819_v59 = vpop.xlane.xlu0 %818 }
 0x870   :  { %3139 = vrcp.f32 %v819_v59 }
 0x873   :  { %v931_v62 = vpop.permute.xlu0 %930 }
 0x874   :  { %v936_v1 = vsel %vm401_vm2, %v931_v62, 0 }
 0x879   :  { %v3138_v0 = vpop.eup %3137 }
 0x87a   :  { %v822_v61 = vmul.f32 %v3138_v0, %v3134_v41 }
 0x87d   :  { %v3140_v60 = vpop.eup %3139 }
 0x87e   :  { %v823_v50 = vmul.f32 %v3140_v60, %v3136_v43 }
 0x880   :  { %v824_v63 = vpack.c.bf16 %v823_v50, %v822_v61 }
 0x882   :  { %2898 = vmatmul.mubr.msk.bf16.vlgmr.msra.gmra.mxu0 %vm401_vm2, %v824_v63 }
 0x883   :  { %2908 = vmatpush3.bf16.xpose.msra.mxu0 %v936_v1  ;;  %2909 = vmatprep.mubr.msk.bf16.mxu0 %vm3395_vm1, %v3394_v16 }
 0x884   :  { %2919 = vmatprep.subr.bf16.mxu0 %v3394_v16 }
 0x88a   :  { %2910 = vmatmul.mubr.msk.bf16.vlgmr.msra.gmra.mxu0 %vm401_vm2, %v929_v2 }
 0x88b   :  { %2921 = vmatprep.mubr.msk.bf16.mxu0 %vm3395_vm1, %v3394_v16 }
 0x942   :  { %v865_v4 = vpop.f32.mrf.mxu0 }
 0x944   :  { %v2899_v5 = vpop.f32.mrf.mxu0 }
 0x945   :  { %v3092_v5 = vld [vmem:[#allocation8] sm:$0xff]  }
 0x946   :  { %v868_v7 = vpop.f32.mrf.mxu0 }
 0x947   :  { %v872_v8 = vpack.c.bf16 %v868_v7, %v865_v4  ;;  %v3091_v4 = vld [vmem:[#allocation8 + $0x8] sm:$0xff]  }
 0x948   :  { %v2900_v9 = vpop.f32.mrf.mxu0 }
 0x949   :  { %2904 = vmatmul.mubr.msk.bf16.vlgmr.msra.gmra.mxu1 %vm401_vm2, %v872_v8 }
 0x94a   :  { %v972_v11 = vpop.f32.mrf.mxu0  ;;  %2915 = vmatprep.mubr.msk.bf16.mxu1 %vm3395_vm1, %v3394_v16 }
 0x94b   :  { %v973_v12 = vadd.f32 %v972_v11, %v3593_v6 }
 0x94c   :  { %v2911_v13 = vpop.f32.mrf.mxu0 }
 0x94d   :  { %v979_v14 = vsel %vm401_vm2, %v973_v12, -inf }
 0x94e   :  { %980 = vmax.xlane.f32.xlu1 %v979_v14  ;;  %v975_v15 = vpop.f32.mrf.mxu0 }
 0x94f   :  { %v976_v17 = vadd.f32 %v975_v15, %v3596_v10 }
 0x950   :  { %v2912_v18 = vpop.f32.mrf.mxu0 }
 0x951   :  { %v982_v19 = vsel %vm401_vm2, %v976_v17, -inf }
 0x952   :  { %983 = vmax.xlane.f32.xlu0 %v982_v19 }
 0x9d7   :  { %v981_v20 = vpop.xlane.xlu1 %980 }
 0x9d8   :  { %v985_v21 = vsub.f32 %v973_v12, %v981_v20 }
 0x9da   :  { %v987_v22 = vmul.f32 1.442695, %v985_v21  ;;  %v2662_v21 = vld [vmem:[#allocation7] ss:$0 sm:$0xff] }
 0x9db   :  { %v984_v23 = vpop.xlane.xlu0 %983 }
 0x9dc   :  { %3141 = vpow2.f32 %v987_v22  ;;  %v986_v24 = vsub.f32 %v976_v17, %v984_v23  ;;  %v2661_v17 = vld [vmem:[%s3975_s8] ss:$0 sm:$0xff] }
 0x9de   :  { %v989_v25 = vmul.f32 1.442695, %v986_v24 }
 0x9e0   :  { %3143 = vpow2.f32 %v989_v25 }
 0x9e9   :  { %v3142_v26 = vpop.eup %3141 }
 0x9ea   :  { %v991_v27 = vsel %vm401_vm2, %v3142_v26, 0.0 }
 0x9eb   :  { %992 = vadd.xlane.f32.xlu0 %v991_v27  ;;  %v3094_v27 = vld [vmem:[%s3979_s12 + $0x10] sm:$0xff]  }
 0x9ed   :  { %v3144_v28 = vpop.eup %3143 }
 0x9ee   :  { %v994_v29 = vsel %vm401_vm2, %v3144_v28, 0.0 }
 0x9ef   :  { %995 = vadd.xlane.f32.xlu1 %v994_v29  ;;  %v3096_v29 = vld [vmem:[%s3979_s12] sm:$0xff]  }
 0xa01   :  { %1002 = vrot.lane.b32.xlu0 %v3578_v44, %s3399_s9  ;;  %v3090_v44 = vld [vmem:[%s3973_s6 + $0x18] sm:$0xff]  }
 0xa02   :  { %2920 = vmatpush3.bf16.msra.mxu0 %v3090_v44 }
 0xa03   :  { %2933 = vmatprep.subr.bf16.mxu0 %v3394_v16 }
 0xa09   :  { %v919_v30 = vpop.f32.mrf.mxu1 }
 0xa0a   :  { %v926_v31 = vadd.f32 %v919_v30, %v749_v51  ;;  %v2663_v30 = vld [vmem:[#allocation10] ss:$0 sm:$0xff] }
 0xa0b   :  { %v2905_v32 = vpop.f32.mrf.mxu1 }
 0xa0d   :  { %v922_v33 = vpop.f32.mrf.mxu1 }
 0xa0e   :  { %v927_v34 = vadd.f32 %v922_v33, %v750_v56 }
 0xa0f   :  { %v2906_v35 = vpop.f32.mrf.mxu1 }
 0xa74   :  { %v993_v36 = vpop.xlane.xlu0 %992 }
 0xa75   :  { %3145 = vrcp.f32 %v993_v36 }
 0xa78   :  { %v996_v37 = vpop.xlane.xlu1 %995  ;;  %v1003_v38 = vpop.permute.xlu0 %1002 }
 0xa79   :  { %3147 = vrcp.f32 %v996_v37  ;;  %2914 = vmatpush3.bf16.msra.mxu1 %v1003_v38 }
 0xa7a   :  { %2925 = vmatprep.subr.bf16.mxu1 %v3394_v16 }
 0xa82   :  { %v3146_v39 = vpop.eup %3145 }
 0xa83   :  { %v999_v41 = vmul.f32 %v3146_v39, %v3142_v26  ;;  %v3093_v26 = vld [vmem:[%s3979_s12 + $0x18] sm:$0xff]  }
 0xa86   :  { %v3148_v40 = vpop.eup %3147 }
 0xa87   :  { %v1000_v42 = vmul.f32 %v3148_v40, %v3144_v28  ;;  %v3095_v28 = vld [vmem:[%s3979_s12 + $0x8] sm:$0xff]  }
 0xa89   :  { %v1001_v43 = vpack.c.bf16 %v1000_v42, %v999_v41 }
 0xa8b   :  { %2916 = vmatmul.mubr.msk.bf16.vlgmr.msra.gmra.mxu1 %vm401_vm2, %v1001_v43 }
 0xa8c   :  { %2929 = vmatprep.mubr.msk.bf16.mxu1 %vm3395_vm1, %v3394_v16  ;;  %2926 = vmatpush3.bf16.msra.mxu1 %v3091_v4 }
 0xa8d   :  { %2927 = vmatprep.subr.bf16.mxu1 %v3394_v16 }
 0xa90   :  { %2928 = vmatpush3.bf16.msra.mxu1 %v3092_v5 }
 0xa91   :  { %2945 = vmatprep.subr.bf16.mxu1 %v3394_v16 }
 0xb4b   :  { %v1042_v45 = vpop.f32.mrf.mxu1 }
 0xb4d   :  { %v2917_v53 = vpop.f32.mrf.mxu1 }
 0xb4f   :  { %v1045_v46 = vpop.f32.mrf.mxu1 }
 0xb50   :  { %v1049_v47 = vpack.c.bf16 %v1045_v46, %v1042_v45 }
 0xb51   :  { %v2918_v48 = vpop.f32.mrf.mxu1 }
 0xb52   :  { %2922 = vmatmul.mubr.msk.bf16.vlgmr.msra.gmra.mxu0 %vm401_vm2, %v1049_v47 }
 0xb53   :  { %2941 = vmatprep.mubr.msk.bf16.mxu0 %vm3395_vm1, %v3394_v16  ;;  %2934 = vmatpush3.bf16.msra.mxu0 %v3093_v26 }
 0xb54   :  { %2935 = vmatprep.subr.bf16.mxu0 %v3394_v16 }
 0xb57   :  { %2936 = vmatpush3.bf16.msra.mxu0 %v3094_v27 }
 0xb58   :  { %2937 = vmatprep.subr.bf16.mxu0 %v3394_v16 }
 0xb5b   :  { %2938 = vmatpush3.bf16.msra.mxu0 %v3095_v28 }
 0xb5c   :  { %2939 = vmatprep.subr.bf16.mxu0 %v3394_v16 }
 0xb5f   :  { %2940 = vmatpush3.bf16.msra.mxu0 %v3096_v29 }
 0xb60   :  { %2961 = vmatprep.subr.bf16.mxu0 %v3394_v16 }
 0xc12   :  { %v1096_v49 = vpop.f32.mrf.mxu0 }
 0xc13   :  { %v3708_v51 = vadd.f32 %v1096_v49, %v926_v31 }
 0xc14   :  { %v2923_v52 = vpop.f32.mrf.mxu0 }
 0xc15   :  { %v1107_v54 = vsel %vm170_vm0, %v3708_v51, 0.0 }
 0xc16   :  { %1108 = vadd.xlane.f32.xlu1 %v1107_v54  ;;  %v1099_v55 = vpop.f32.mrf.mxu0 }
 0xc17   :  { %v3712_v56 = vadd.f32 %v1099_v55, %v927_v34 }
 0xc18   :  { %v2924_v57 = vpop.f32.mrf.mxu0 }
 0xc19   :  { %v1110_v58 = vsel %vm170_vm0, %v3712_v56, 0.0 }
 0xc1a   :  { %1111 = vadd.xlane.f32.xlu1 %v1110_v58 }
 0xc9f   :  { %v1109_v59 = vpop.xlane.xlu1 %1108 }
 0xca0   :  { %v1113_v0 = vmul.f32 0.03125, %v1109_v59 }
 0xca2   :  { %v1115_v60 = vsub.f32 %v3708_v51, %v1113_v0 }
 0xca3   :  { %v1112_v61 = vpop.xlane.xlu1 %1111 }
 0xca4   :  { %v1114_v50 = vmul.f32 0.03125, %v1112_v61  ;;  %v1117_v62 = vmul.f32 %v1115_v60, %v1115_v60 }
 0xca6   :  { %v1116_v63 = vsub.f32 %v3712_v56, %v1114_v50  ;;  %v1119_v1 = vsel %vm170_vm0, %v1117_v62, 0.0 }
 0xca7   :  { %1120 = vadd.xlane.f32.xlu1 %v1119_v1 }
 0xca8   :  { %v1118_v2 = vmul.f32 %v1116_v63, %v1116_v63 }
 0xcaa   :  { %v1122_v3 = vsel %vm170_vm0, %v1118_v2, 0.0 }
 0xcab   :  { %1123 = vadd.xlane.f32.xlu1 %v1122_v3 }
 0xd30   :  { %v1121_v7 = vpop.xlane.xlu1 %1120 }
 0xd31   :  { %v1125_v8 = vmul.f32 0.03125, %v1121_v7 }
 0xd33   :  { %v1127_v9 = vadd.f32 1e-05, %v1125_v8 }
 0xd34   :  { %v1124_v11 = vpop.xlane.xlu1 %1123 }
 0xd35   :  { %3149 = vrsqrt.f32 %v1127_v9  ;;  %v1126_v12 = vmul.f32 0.03125, %v1124_v11 }
 0xd37   :  { %v1128_v13 = vadd.f32 1e-05, %v1126_v12 }
 0xd39   :  { %3151 = vrsqrt.f32 %v1128_v13 }
 0xd42   :  { %v3150_v14 = vpop.eup %3149 }
 0xd43   :  { %v1131_v15 = vmul.f32 %v3150_v14, %v1115_v60 }
 0xd45   :  { %v1139_v20 = vmul.f32 %v2661_v17, %v1131_v15 }
 0xd46   :  { %v3152_v18 = vpop.eup %3151 }
 0xd47   :  { %v1132_v19 = vmul.f32 %v3152_v18, %v1116_v63  ;;  %v1147_v23 = vadd.f32 %v2662_v21, %v1139_v20 }
 0xd49   :  { %v1140_v22 = vmul.f32 %v2661_v17, %v1132_v19 }
 0xd4b   :  { %v1148_v24 = vadd.f32 %v2662_v21, %v1140_v22 }
 0xd4d   :  { %v1149_v25 = vpack.c.bf16 %v1148_v24, %v1147_v23 }
 0xd4f   :  { %2930 = vmatmul.mubr.msk.bf16.vlgmr.msra.gmra.mxu1 %vm170_vm0, %v1149_v25 }
 0xd50   :  { %2949 = vmatprep.mubr.msk.bf16.mxu1 %vm3395_vm1, %v3394_v16 }
 0xe0f   :  { %v1210_v31 = vpop.f32.mrf.mxu1 }
 0xe10   :  { %v1211_v32 = vadd.f32 %v2663_v30, %v1210_v31 }
 0xe11   :  { %v2931_v33 = vpop.f32.mrf.mxu1 }
 0xe12   :  { %v1219_v34 = vmul.f32 0.70710677, %v1211_v32  ;;  %v1217_v23 = vmul.f32 0.5, %v1211_v32 }
 0xe13   :  { %v1213_v35 = vpop.f32.mrf.mxu1 }
 0xe14   :  { %v1221_v36 = vand.u32 2147483647, %v1219_v34  ;;  %v1214_v37 = vadd.f32 %v2663_v30, %v1213_v35  ;;  %vm1261_vm5 = vcmp.lt.f32.partialorder %v1219_v34, 0.0  ;;  %v2676_v30 = vld [vmem:[#allocation11] ss:$0 sm:$0xff] }
 0xe15   :  { %v2932_v38 = vpop.f32.mrf.mxu1 }
 0xe16   :  { %v1223_v39 = vmul.f32 0.3275911, %v1221_v36  ;;  %v1220_v40 = vmul.f32 0.70710677, %v1214_v37  ;;  %v1249_v45 = vsub.f32 0.0, %v1221_v36  ;;  %v1218_v24 = vmul.f32 0.5, %v1214_v37 }
 0xe18   :  { %v1225_v41 = vadd.f32 1.0, %v1223_v39  ;;  %v1222_v42 = vand.u32 2147483647, %v1220_v40  ;;  %v1251_v53 = vmul.f32 %v1249_v45, %v1221_v36  ;;  %vm1262_vm6 = vcmp.lt.f32.partialorder %v1220_v40, 0.0 }
 0xe1a   :  { %3153 = vrcp.f32 %v1225_v41  ;;  %v1224_v43 = vmul.f32 0.3275911, %v1222_v42  ;;  %v1250_v46 = vsub.f32 0.0, %v1222_v42  ;;  %v1253_v49 = vmul.f32 1.442695, %v1251_v53 }
 0xe1c   :  { %v1226_v44 = vadd.f32 1.0, %v1224_v43  ;;  %v1252_v52 = vmul.f32 %v1250_v46, %v1222_v42 }
 0xe1e   :  { %3155 = vrcp.f32 %v1226_v44  ;;  %v1255_v59 = vmul.f32 1.442695, %v1252_v52  ;;  %v3100_v52 = vld [vmem:[#allocation5 + $0x10] sm:$0xff]  }
 0xe1f   :  { %3157 = vpow2.f32 %v1253_v49  ;;  %v3099_v49 = vld [vmem:[%s3970_s3 + $0x10] sm:$0xff]  }
 0xe20   :  { %3159 = vpow2.f32 %v1255_v59 }
 0xe27   :  { %v3154_v47 = vpop.eup %3153 }
 0xe28   :  { %v1231_v48 = vmul.f32 1.0614054, %v3154_v47 }
 0xe2a   :  { %v2667_v54 = vadd.f32 -1.4531521, %v1231_v48  ;;  %v3098_v48 = vld [vmem:[#allocation5 + $0x18] sm:$0xff]  }
 0xe2b   :  { %v3156_v55 = vpop.eup %3155 }
 0xe2c   :  { %v1235_v57 = vmul.f32 %v3154_v47, %v2667_v54  ;;  %v1232_v58 = vmul.f32 1.0614054, %v3156_v55  ;;  %v3158_v8 = vpop.eup %3157 }
 0xe2d   :  { %v3160_v14 = vpop.eup %3159 }
 0xe2e   :  { %v1237_v0 = vadd.f32 1.4214138, %v1235_v57  ;;  %v2668_v60 = vadd.f32 -1.4531521, %v1232_v58 }
 0xe30   :  { %v1239_v61 = vmul.f32 %v3154_v47, %v1237_v0  ;;  %v1236_v50 = vmul.f32 %v3156_v55, %v2668_v60 }
 0xe32   :  { %v2669_v62 = vadd.f32 -0.28449672, %v1239_v61  ;;  %v1238_v63 = vadd.f32 1.4214138, %v1236_v50  ;;  %v2679_v50 = vld [vmem:[%s3968_s1 + $0x1] ss:$0 sm:$0xff] }
 0xe34   :  { %v1243_v1 = vmul.f32 %v3154_v47, %v2669_v62  ;;  %v1240_v2 = vmul.f32 %v3156_v55, %v1238_v63 }
 0xe36   :  { %v1245_v3 = vadd.f32 0.2548296, %v1243_v1  ;;  %v2670_v4 = vadd.f32 -0.28449672, %v1240_v2  ;;  %v2680_v2 = vld [vmem:[%s3969_s2 + $0x1] ss:$0 sm:$0xff] }
 0xe38   :  { %v1247_v5 = vmul.f32 %v3154_v47, %v1245_v3  ;;  %v1244_v7 = vmul.f32 %v3156_v55, %v2670_v4  ;;  %v3097_v47 = vld [vmem:[%s3970_s3 + $0x18] sm:$0xff]  }
 0xe39   :  { %2946 = vmatpush3.bf16.msra.mxu1 %v3097_v47 }
 0xe3a   :  { %v1257_v9 = vmul.f32 %v3158_v8, %v1247_v5  ;;  %v1246_v11 = vadd.f32 0.2548296, %v1244_v7  ;;  %2947 = vmatprep.subr.bf16.mxu1 %v3394_v16  ;;  %v3101_v7 = vld [vmem:[#allocation2 + $0x18] sm:$0xff]  }
 0xe3c   :  { %v1259_v12 = vsub.f32 1.0, %v1257_v9  ;;  %v1248_v13 = vmul.f32 %v3156_v55, %v1246_v11  ;;  %v3102_v9 = vld [vmem:[#allocation2 + $0x10] sm:$0xff]  }
 0xe3d   :  { %2948 = vmatpush3.bf16.msra.mxu1 %v3099_v49 }
 0xe3e   :  { %v1263_v15 = vsub.f32 0.0, %v1259_v12  ;;  %v1258_v17 = vmul.f32 %v3160_v14, %v1248_v13  ;;  %2953 = vmatprep.subr.bf16.mxu1 %v3394_v16 }
 0xe40   :  { %v1265_v18 = vsel %vm1261_vm5, %v1263_v15, %v1259_v12  ;;  %v1260_v19 = vsub.f32 1.0, %v1258_v17 }
 0xe41   :  { %v1267_v21 = vadd.f32 1.0, %v1265_v18 }
 0xe42   :  { %v1264_v20 = vsub.f32 0.0, %v1260_v19 }
 0xe43   :  { %v1269_v26 = vmul.f32 %v1267_v21, %v1217_v23 }
 0xe44   :  { %v1266_v22 = vsel %vm1262_vm6, %v1264_v20, %v1260_v19 }
 0xe45   :  { %v1268_v25 = vadd.f32 1.0, %v1266_v22 }
 0xe47   :  { %v1270_v27 = vmul.f32 %v1268_v25, %v1218_v24 }
 0xe49   :  { %v1271_v28 = vpack.c.bf16 %v1270_v27, %v1269_v26 }
 0xe4b   :  { %2942 = vmatmul.mubr.msk.bf16.vlgmr.msra.gmra.mxu0 %vm1304_vm7, %v1271_v28 }
 0xe4c   :  { %2965 = vmatprep.mubr.msk.bf16.mxu0 %vm3395_vm1, %v3394_v16  ;;  %2962 = vmatpush3.bf16.msra.mxu0 %v3098_v48 }
 0xe4d   :  { %2963 = vmatprep.subr.bf16.mxu0 %v3394_v16 }
 0xe50   :  { %2964 = vmatpush3.bf16.msra.mxu0 %v3100_v52 }
 0xe51   :  { %2975 = vmatprep.subr.bf16.mxu0 %v3394_v16 }
 0xf0b   :  { %v1342_v29 = vpop.f32.mrf.mxu0 }
 0xf0c   :  { %v1349_v31 = vadd.f32 %v1342_v29, %v3708_v51 }
 0xf0d   :  { %v2943_v33 = vpop.f32.mrf.mxu0 }
 0xf0e   :  { %v3748_v34 = vadd.f32 %v2676_v30, %v1349_v31 }
 0xf0f   :  { %v1345_v35 = vpop.f32.mrf.mxu0 }
 0xf10   :  { %v1350_v32 = vadd.f32 %v1345_v35, %v3712_v56  ;;  %v1364_v36 = vsel %vm170_vm0, %v3748_v34, 0.0 }
 0xf11   :  { %1365 = vadd.xlane.f32.xlu1 %v1364_v36  ;;  %v2944_v37 = vpop.f32.mrf.mxu0 }
 0xf12   :  { %v3753_v38 = vadd.f32 %v2676_v30, %v1350_v32 }
 0xf14   :  { %v1367_v39 = vsel %vm170_vm0, %v3753_v38, 0.0 }
 0xf15   :  { %1368 = vadd.xlane.f32.xlu1 %v1367_v39 }
 0xf9a   :  { %v1366_v40 = vpop.xlane.xlu1 %1365 }
 0xf9b   :  { %v1370_v41 = vmul.f32 0.03125, %v1366_v40 }
 0xf9d   :  { %v1372_v51 = vsub.f32 %v3748_v34, %v1370_v41 }
 0xf9e   :  { %v1369_v42 = vpop.xlane.xlu1 %1368 }
 0xf9f   :  { %v1371_v43 = vmul.f32 0.03125, %v1369_v42  ;;  %v1374_v44 = vmul.f32 %v1372_v51, %v1372_v51 }
 0xfa1   :  { %v1373_v56 = vsub.f32 %v3753_v38, %v1371_v43  ;;  %v1376_v45 = vsel %vm170_vm0, %v1374_v44, 0.0 }
 0xfa2   :  { %1377 = vadd.xlane.f32.xlu0 %v1376_v45 }
 0xfa3   :  { %v1375_v53 = vmul.f32 %v1373_v56, %v1373_v56 }
 0xfa5   :  { %v1379_v46 = vsel %vm170_vm0, %v1375_v53, 0.0 }
 0xfa6   :  { %1380 = vadd.xlane.f32.xlu1 %v1379_v46 }
0x102b   :  { %v1378_v54 = vpop.xlane.xlu0 %1377 }
0x102c   :  { %v1382_v55 = vmul.f32 0.03125, %v1378_v54 }
0x102e   :  { %v1384_v57 = vadd.f32 1e-05, %v1382_v55 }
0x102f   :  { %v1381_v58 = vpop.xlane.xlu1 %1380 }
0x1030   :  { %3161 = vrsqrt.f32 %v1384_v57  ;;  %v1383_v59 = vmul.f32 0.03125, %v1381_v58 }
0x1032   :  { %v1385_v0 = vadd.f32 1e-05, %v1383_v59  ;;  %v3103_v59 = vld [vmem:[%s3973_s6 + $0x20] sm:$0xff]  }
0x1034   :  { %3163 = vrsqrt.f32 %v1385_v0 }
0x103d   :  { %v3162_v60 = vpop.eup %3161 }
0x103e   :  { %v1388_v61 = vmul.f32 %v3162_v60, %v1372_v51 }
0x1040   :  { %v1396_v1 = vmul.f32 %v2679_v50, %v1388_v61 }
0x1041   :  { %v3164_v62 = vpop.eup %3163 }
0x1042   :  { %v1389_v63 = vmul.f32 %v3164_v62, %v1373_v56  ;;  %v1404_v4 = vadd.f32 %v2680_v2, %v1396_v1 }
0x1044   :  { %v1397_v3 = vmul.f32 %v2679_v50, %v1389_v63 }
0x1046   :  { %v1405_v5 = vadd.f32 %v2680_v2, %v1397_v3 }
0x1048   :  { %v1406_v8 = vpack.c.bf16 %v1405_v5, %v1404_v4 }
0x104a   :  { %2950 = vmatmul.mubr.msk.bf16.vlgmr.msra.gmra.mxu1 %vm170_vm0, %v1406_v8  ;;  %2966 = vmatmul.mubr.msk.bf16.vlgmr.msra.gmra.mxu0 %vm170_vm0, %v1406_v8 }
0x104b   :  { %2954 = vmatpush3.bf16.msra.mxu1 %v3101_v7  ;;  %2957 = vmatprep.mubr.msk.bf16.mxu1 %vm3395_vm1, %v3394_v16 }
0x104c   :  { %2955 = vmatprep.subr.bf16.mxu1 %v3394_v16  ;;  %2977 = vmatprep.mubr.msk.bf16.mxu0 %vm3395_vm1, %v3394_v16 }
0x104f   :  { %2956 = vmatpush3.bf16.msra.mxu1 %v3102_v9 }
0x1050   :  { %2969 = vmatprep.subr.bf16.mxu1 %v3394_v16 }
0x1052   :  { %2958 = vmatmul.mubr.msk.bf16.vlgmr.msra.gmra.mxu1 %vm170_vm0, %v1406_v8 }
0x1053   :  { %2971 = vmatprep.mubr.msk.bf16.mxu1 %vm3395_vm1, %v3394_v16 }
0x110a   :  { %v1461_v11 = vpop.f32.mrf.mxu1  ;;  %v1579_v12 = vpop.f32.mrf.mxu0 }
0x110c   :  { %v2951_v13 = vpop.f32.mrf.mxu1  ;;  %v2967_v14 = vpop.f32.mrf.mxu0 }
0x110e   :  { %v1464_v15 = vpop.f32.mrf.mxu1  ;;  %v1582_v17 = vpop.f32.mrf.mxu0 }
0x110f   :  { %v3788_v18 = vpack.c.bf16 %v1464_v15, %v1461_v11  ;;  %v3790_v19 = vpack.c.bf16 %v1582_v17, %v1579_v12 }
0x1110   :  { %v2952_v20 = vpop.f32.mrf.mxu1  ;;  %v2968_v21 = vpop.f32.mrf.mxu0 }
0x1111   :  { %2976 = vmatpush3.bf16.msra.mxu0 %v3790_v19  ;;  %1768 = vrot.lane.b32.xlu0 %v3788_v18, %s3397_s4 }
0x1112   :  { %v1520_v22 = vpop.f32.mrf.mxu1  ;;  %2987 = vmatprep.subr.bf16.mxu0 %v3394_v16 }
0x1114   :  { %v2959_v23 = vpop.f32.mrf.mxu1 }
0x1116   :  { %v1523_v24 = vpop.f32.mrf.mxu1 }
0x1117   :  { %v3796_v25 = vpack.c.bf16 %v1523_v24, %v1520_v22 }
0x1118   :  { %v2960_v26 = vpop.f32.mrf.mxu1 }
0x1119   :  { %v1601_v27 = vsel %vm401_vm2, %v3796_v25, 0 }
0x111a   :  { %2970 = vmatpush3.bf16.xpose.msra.mxu1 %v1601_v27 }
0x111b   :  { %2981 = vmatprep.subr.bf16.mxu1 %v3394_v16 }
0x1121   :  { %2972 = vmatmul.mubr.msk.bf16.vlgmr.msra.gmra.mxu1 %vm401_vm2, %v3788_v18 }
0x1122   :  { %2983 = vmatprep.mubr.msk.bf16.mxu1 %vm3395_vm1, %v3394_v16  ;;  %2982 = vmatpush3.bf16.msra.mxu1 %v3103_v59 }
0x1123   :  { %2993 = vmatprep.subr.bf16.mxu1 %v3394_v16 }
0x1183   :  { %v1769_v58 = vpop.permute.xlu0 %1768 }
0x11e1   :  { %v1637_v28 = vpop.f32.mrf.mxu1 }
0x11e2   :  { %v1638_v29 = vadd.f32 %v1637_v28, %v3593_v6 }
0x11e3   :  { %v2973_v30 = vpop.f32.mrf.mxu1 }
0x11e4   :  { %v1644_v31 = vsel %vm401_vm2, %v1638_v29, -inf }
0x11e5   :  { %1645 = vmax.xlane.f32.xlu1 %v1644_v31  ;;  %v1640_v33 = vpop.f32.mrf.mxu1 }
0x11e6   :  { %v1641_v35 = vadd.f32 %v1640_v33, %v3596_v10 }
0x11e7   :  { %v2974_v32 = vpop.f32.mrf.mxu1 }
0x11e8   :  { %v1647_v36 = vsel %vm401_vm2, %v1641_v35, -inf }
0x11e9   :  { %1648 = vmax.xlane.f32.xlu1 %v1647_v36 }
0x126e   :  { %v1646_v37 = vpop.xlane.xlu1 %1645 }
0x126f   :  { %v1650_v39 = vsub.f32 %v1638_v29, %v1646_v37 }
0x1271   :  { %v1652_v40 = vmul.f32 1.442695, %v1650_v39 }
0x1272   :  { %v1649_v41 = vpop.xlane.xlu1 %1648 }
0x1273   :  { %3165 = vpow2.f32 %v1652_v40  ;;  %v1651_v51 = vsub.f32 %v1641_v35, %v1649_v41  ;;  %v3104_v41 = vld [vmem:[%s3973_s6 + $0x28] sm:$0xff]  }
0x1275   :  { %v1654_v42 = vmul.f32 1.442695, %v1651_v51 }
0x1277   :  { %3167 = vpow2.f32 %v1654_v42 }
0x1280   :  { %v3166_v43 = vpop.eup %3165 }
0x1281   :  { %v1656_v44 = vsel %vm401_vm2, %v3166_v43, 0.0 }
0x1282   :  { %1657 = vadd.xlane.f32.xlu1 %v1656_v44 }
0x1284   :  { %v3168_v56 = vpop.eup %3167 }
0x1285   :  { %v1659_v45 = vsel %vm401_vm2, %v3168_v56, 0.0 }
0x1286   :  { %1660 = vadd.xlane.f32.xlu1 %v1659_v45 }
0x1297   :  { %1771 = vrot.lane.b32.xlu1 %v3796_v25, %s3397_s4 }
0x130b   :  { %v1658_v53 = vpop.xlane.xlu1 %1657 }
0x130c   :  { %3169 = vrcp.f32 %v1658_v53 }
0x130f   :  { %v1661_v46 = vpop.xlane.xlu1 %1660 }
0x1310   :  { %3171 = vrcp.f32 %v1661_v46 }
0x1313   :  { %v1772_v54 = vpop.permute.xlu1 %1771 }
0x1314   :  { %v1777_v57 = vsel %vm401_vm2, %v1772_v54, 0 }
0x1319   :  { %v3170_v47 = vpop.eup %3169 }
0x131a   :  { %v1664_v49 = vmul.f32 %v3170_v47, %v3166_v43 }
0x131d   :  { %v3172_v48 = vpop.eup %3171 }
0x131e   :  { %v1665_v52 = vmul.f32 %v3172_v48, %v3168_v56 }
0x1320   :  { %v1666_v55 = vpack.c.bf16 %v1665_v52, %v1664_v49 }
0x1322   :  { %2978 = vmatmul.mubr.msk.bf16.vlgmr.msra.gmra.mxu0 %vm401_vm2, %v1666_v55 }
0x1323   :  { %2988 = vmatpush3.bf16.xpose.msra.mxu0 %v1777_v57  ;;  %2989 = vmatprep.mubr.msk.bf16.mxu0 %vm3395_vm1, %v3394_v16 }
0x1324   :  { %2999 = vmatprep.subr.bf16.mxu0 %v3394_v16 }
0x132a   :  { %2990 = vmatmul.mubr.msk.bf16.vlgmr.msra.gmra.mxu0 %vm401_vm2, %v1769_v58 }
0x132b   :  { %3001 = vmatprep.mubr.msk.bf16.mxu0 %vm3395_vm1, %v3394_v16  ;;  %3000 = vmatpush3.bf16.msra.mxu0 %v3104_v41 }
0x132c   :  { %3011 = vmatprep.subr.bf16.mxu0 %v3394_v16 }
0x13e2   :  { %v1704_v0 = vpop.f32.mrf.mxu0 }
0x13e4   :  { %v2979_v60 = vpop.f32.mrf.mxu0 }
0x13e6   :  { %v1707_v61 = vpop.f32.mrf.mxu0 }
0x13e7   :  { %v1711_v50 = vpack.c.bf16 %v1707_v61, %v1704_v0 }
0x13e8   :  { %v2980_v62 = vpop.f32.mrf.mxu0 }
0x13e9   :  { %2984 = vmatmul.mubr.msk.bf16.vlgmr.msra.gmra.mxu1 %vm401_vm2, %v1711_v50 }
0x13ea   :  { %v1813_v63 = vpop.f32.mrf.mxu0  ;;  %2995 = vmatprep.mubr.msk.bf16.mxu1 %vm3395_vm1, %v3394_v16 }
0x13eb   :  { %v1814_v1 = vadd.f32 %v1813_v63, %v3593_v6 }
0x13ec   :  { %v2991_v2 = vpop.f32.mrf.mxu0 }
0x13ed   :  { %v1820_v3 = vsel %vm401_vm2, %v1814_v1, -inf }
0x13ee   :  { %1821 = vmax.xlane.f32.xlu1 %v1820_v3  ;;  %v1816_v4 = vpop.f32.mrf.mxu0 }
0x13ef   :  { %v1817_v5 = vadd.f32 %v1816_v4, %v3596_v10 }
0x13f0   :  { %v2992_v7 = vpop.f32.mrf.mxu0 }
0x13f1   :  { %v1823_v8 = vsel %vm401_vm2, %v1817_v5, -inf }
0x13f2   :  { %1824 = vmax.xlane.f32.xlu0 %v1823_v8 }
0x1408   :  { %1949 = vrot.lane.b32.xlu0 %v3796_v25, %s3398_s21 }
0x1477   :  { %v1822_v9 = vpop.xlane.xlu1 %1821 }
0x1478   :  { %v1826_v11 = vsub.f32 %v1814_v1, %v1822_v9  ;;  %v2695_v1 = vld [vmem:[%s3974_s7 + $0x1] ss:$0 sm:$0xff] }
0x1479   :  { %v1595_v2 = vadd.f32 %v2695_v1, %v3748_v34 }
0x147a   :  { %v1828_v12 = vmul.f32 1.442695, %v1826_v11 }
0x147b   :  { %v1825_v13 = vpop.xlane.xlu0 %1824 }
0x147c   :  { %3173 = vpow2.f32 %v1828_v12  ;;  %v1827_v14 = vsub.f32 %v1817_v5, %v1825_v13  ;;  %v1596_v5 = vadd.f32 %v2695_v1, %v3753_v38 }
0x147e   :  { %v1830_v15 = vmul.f32 1.442695, %v1827_v14 }
0x147f   :  { %v1950_v36 = vpop.permute.xlu0 %1949 }
0x1480   :  { %3175 = vpow2.f32 %v1830_v15  ;;  %v1955_v39 = vsel %vm401_vm2, %v1950_v36, 0 }
0x1489   :  { %v3174_v17 = vpop.eup %3173 }
0x148a   :  { %v1832_v20 = vsel %vm401_vm2, %v3174_v17, 0.0 }
0x148b   :  { %1833 = vadd.xlane.f32.xlu1 %v1832_v20 }
0x148d   :  { %v3176_v21 = vpop.eup %3175 }
0x148e   :  { %v1835_v22 = vsel %vm401_vm2, %v3176_v21, 0.0 }
0x148f   :  { %1836 = vadd.xlane.f32.xlu1 %v1835_v22 }
0x14a0   :  { %1844 = vrot.lane.b32.xlu1 %v3790_v19, %s3397_s4 }
0x14a4   :  { %1947 = vrot.lane.b32.xlu1 %v3788_v18, %s3398_s21 }
0x14a9   :  { %v3840_v23 = vpop.f32.mrf.mxu1 }
0x14aa   :  { %v1765_v3 = vadd.f32 %v3840_v23, %v1595_v2 }
0x14ab   :  { %v2985_v24 = vpop.f32.mrf.mxu1 }
0x14ac   :  { %v3105_v24 = vld [vmem:[%s3973_s6 + $0x30] sm:$0xff]  }
0x14ad   :  { %v3842_v26 = vpop.f32.mrf.mxu1 }
0x14ae   :  { %v1766_v8 = vadd.f32 %v3842_v26, %v1596_v5 }
0x14af   :  { %v2986_v27 = vpop.f32.mrf.mxu1 }
0x1514   :  { %v1834_v28 = vpop.xlane.xlu1 %1833 }
0x1515   :  { %3177 = vrcp.f32 %v1834_v28 }
0x1518   :  { %v1837_v29 = vpop.xlane.xlu1 %1836 }
0x1519   :  { %3179 = vrcp.f32 %v1837_v29 }
0x151c   :  { %v1845_v30 = vpop.permute.xlu1 %1844 }
0x151d   :  { %2994 = vmatpush3.bf16.msra.mxu1 %v1845_v30 }
0x151e   :  { %3005 = vmatprep.subr.bf16.mxu1 %v3394_v16 }
0x1520   :  { %v1948_v40 = vpop.permute.xlu1 %1947 }
0x1522   :  { %v3178_v31 = vpop.eup %3177 }
0x1523   :  { %v1840_v35 = vmul.f32 %v3178_v31, %v3174_v17 }
0x1526   :  { %v3180_v33 = vpop.eup %3179 }
0x1527   :  { %v1841_v32 = vmul.f32 %v3180_v33, %v3176_v21 }
0x1529   :  { %v1842_v37 = vpack.c.bf16 %v1841_v32, %v1840_v35 }
0x152b   :  { %2996 = vmatmul.mubr.msk.bf16.vlgmr.msra.gmra.mxu1 %vm401_vm2, %v1842_v37 }
0x152c   :  { %3006 = vmatpush3.bf16.xpose.msra.mxu1 %v1955_v39  ;;  %3007 = vmatprep.mubr.msk.bf16.mxu1 %vm3395_vm1, %v3394_v16 }
0x152d   :  { %3017 = vmatprep.subr.bf16.mxu1 %v3394_v16 }
0x1533   :  { %3008 = vmatmul.mubr.msk.bf16.vlgmr.msra.gmra.mxu1 %vm401_vm2, %v1948_v40 }
0x1534   :  { %3019 = vmatprep.mubr.msk.bf16.mxu1 %vm3395_vm1, %v3394_v16  ;;  %3018 = vmatpush3.bf16.msra.mxu1 %v3105_v24  ;;  %v3108_v24 = vld [vmem:[#allocation8 + $0x10] sm:$0xff]  }
0x1535   :  { %3029 = vmatprep.subr.bf16.mxu1 %v3394_v16 }
0x15eb   :  { %v1884_v51 = vpop.f32.mrf.mxu1 }
0x15ed   :  { %v2997_v42 = vpop.f32.mrf.mxu1 }
0x15ef   :  { %v1887_v43 = vpop.f32.mrf.mxu1 }
0x15f0   :  { %v1891_v44 = vpack.c.bf16 %v1887_v43, %v1884_v51 }
0x15f1   :  { %v2998_v56 = vpop.f32.mrf.mxu1 }
0x15f2   :  { %3002 = vmatmul.mubr.msk.bf16.vlgmr.msra.gmra.mxu0 %vm401_vm2, %v1891_v44 }
0x15f3   :  { %v1991_v45 = vpop.f32.mrf.mxu1  ;;  %3013 = vmatprep.mubr.msk.bf16.mxu0 %vm3395_vm1, %v3394_v16 }
0x15f4   :  { %v1992_v53 = vadd.f32 %v1991_v45, %v3593_v6 }
0x15f5   :  { %v3009_v46 = vpop.f32.mrf.mxu1 }
0x15f6   :  { %v1998_v47 = vsel %vm401_vm2, %v1992_v53, -inf }
0x15f7   :  { %1999 = vmax.xlane.f32.xlu1 %v1998_v47  ;;  %v1994_v48 = vpop.f32.mrf.mxu1 }
0x15f8   :  { %v1995_v49 = vadd.f32 %v1994_v48, %v3596_v10 }
0x15f9   :  { %v3010_v52 = vpop.f32.mrf.mxu1 }
0x15fa   :  { %v2001_v54 = vsel %vm401_vm2, %v1995_v49, -inf }
0x15fb   :  { %2002 = vmax.xlane.f32.xlu0 %v2001_v54 }
0x1680   :  { %v2000_v55 = vpop.xlane.xlu1 %1999 }
0x1681   :  { %v2004_v57 = vsub.f32 %v1992_v53, %v2000_v55 }
0x1683   :  { %v2006_v58 = vmul.f32 1.442695, %v2004_v57 }
0x1684   :  { %v2003_v59 = vpop.xlane.xlu0 %2002 }
0x1685   :  { %3181 = vpow2.f32 %v2006_v58  ;;  %v2005_v0 = vsub.f32 %v1995_v49, %v2003_v59 }
0x1687   :  { %v2008_v60 = vmul.f32 1.442695, %v2005_v0 }
0x1689   :  { %3183 = vpow2.f32 %v2008_v60 }
0x1692   :  { %v3182_v61 = vpop.eup %3181 }
0x1693   :  { %v2010_v50 = vsel %vm401_vm2, %v3182_v61, 0.0 }
0x1694   :  { %2011 = vadd.xlane.f32.xlu0 %v2010_v50  ;;  %v3106_v50 = vld [vmem:[%s3973_s6 + $0x38] sm:$0xff]  }
0x1696   :  { %v3184_v62 = vpop.eup %3183 }
0x1697   :  { %v2013_v63 = vsel %vm401_vm2, %v3184_v62, 0.0 }
0x1698   :  { %2014 = vadd.xlane.f32.xlu1 %v2013_v63 }
0x16a9   :  { %2126 = vrot.lane.b32.xlu1 %v3796_v25, %s3399_s9 }
0x16aa   :  { %2021 = vrot.lane.b32.xlu0 %v3790_v19, %s3398_s21 }
0x16ad   :  { %2124 = vrot.lane.b32.xlu1 %v3788_v18, %s3399_s9 }
0x16b2   :  { %v1938_v4 = vpop.f32.mrf.mxu0 }
0x16b3   :  { %v3878_v7 = vadd.f32 %v1938_v4, %v1765_v3 }
0x16b4   :  { %v3003_v25 = vpop.f32.mrf.mxu0 }
0x16b6   :  { %v1941_v9 = vpop.f32.mrf.mxu0 }
0x16b7   :  { %v3881_v11 = vadd.f32 %v1941_v9, %v1766_v8 }
0x16b8   :  { %v3004_v12 = vpop.f32.mrf.mxu0 }
0x171d   :  { %v2012_v13 = vpop.xlane.xlu0 %2011 }
0x171e   :  { %3185 = vrcp.f32 %v2012_v13 }
0x1721   :  { %v2015_v14 = vpop.xlane.xlu1 %2014  ;;  %v2022_v18 = vpop.permute.xlu0 %2021 }
0x1722   :  { %3187 = vrcp.f32 %v2015_v14  ;;  %3012 = vmatpush3.bf16.msra.mxu0 %v2022_v18 }
0x1723   :  { %3023 = vmatprep.subr.bf16.mxu0 %v3394_v16 }
0x1725   :  { %v2127_v20 = vpop.permute.xlu1 %2126 }
0x1726   :  { %v2132_v22 = vsel %vm401_vm2, %v2127_v20, 0 }
0x1729   :  { %v2125_v23 = vpop.permute.xlu1 %2124 }
0x172b   :  { %v3186_v34 = vpop.eup %3185 }
0x172c   :  { %v2018_v38 = vmul.f32 %v3186_v34, %v3182_v61 }
0x172f   :  { %v3188_v15 = vpop.eup %3187 }
0x1730   :  { %v2019_v17 = vmul.f32 %v3188_v15, %v3184_v62 }
0x1732   :  { %v2020_v21 = vpack.c.bf16 %v2019_v17, %v2018_v38 }
0x1734   :  { %3014 = vmatmul.mubr.msk.bf16.vlgmr.msra.gmra.mxu0 %vm401_vm2, %v2020_v21 }
0x1735   :  { %3024 = vmatpush3.bf16.xpose.msra.mxu0 %v2132_v22  ;;  %3025 = vmatprep.mubr.msk.bf16.mxu0 %vm3395_vm1, %v3394_v16 }
0x1736   :  { %3035 = vmatprep.subr.bf16.mxu0 %v3394_v16 }
0x173c   :  { %3026 = vmatmul.mubr.msk.bf16.vlgmr.msra.gmra.mxu0 %vm401_vm2, %v2125_v23  ;;  %v3107_v23 = vld [vmem:[#allocation8 + $0x18] sm:$0xff]  }
0x173d   :  { %3037 = vmatprep.mubr.msk.bf16.mxu0 %vm3395_vm1, %v3394_v16  ;;  %3036 = vmatpush3.bf16.msra.mxu0 %v3106_v50 }
0x173e   :  { %3049 = vmatprep.subr.bf16.mxu0 %v3394_v16 }
0x17f4   :  { %v2061_v26 = vpop.f32.mrf.mxu0 }
0x17f6   :  { %v3015_v27 = vpop.f32.mrf.mxu0 }
0x17f8   :  { %v2064_v28 = vpop.f32.mrf.mxu0 }
0x17f9   :  { %v2068_v29 = vpack.c.bf16 %v2064_v28, %v2061_v26 }
0x17fa   :  { %v3016_v30 = vpop.f32.mrf.mxu0 }
0x17fb   :  { %3020 = vmatmul.mubr.msk.bf16.vlgmr.msra.gmra.mxu1 %vm401_vm2, %v2068_v29 }
0x17fc   :  { %v2168_v31 = vpop.f32.mrf.mxu0  ;;  %3031 = vmatprep.mubr.msk.bf16.mxu1 %vm3395_vm1, %v3394_v16 }
0x17fd   :  { %v2169_v33 = vadd.f32 %v2168_v31, %v3593_v6 }
0x17fe   :  { %v3027_v35 = vpop.f32.mrf.mxu0 }
0x17ff   :  { %v2175_v32 = vsel %vm401_vm2, %v2169_v33, -inf }
0x1800   :  { %2176 = vmax.xlane.f32.xlu0 %v2175_v32  ;;  %v2171_v36 = vpop.f32.mrf.mxu0  ;;  %v2721_v32 = vld [vmem:[%s3975_s8 + $0x1] ss:$0 sm:$0xff] }
0x1801   :  { %v2172_v37 = vadd.f32 %v2171_v36, %v3596_v10 }
0x1802   :  { %v3028_v39 = vpop.f32.mrf.mxu0 }
0x1803   :  { %v2178_v40 = vsel %vm401_vm2, %v2172_v37, -inf }
0x1804   :  { %2179 = vmax.xlane.f32.xlu1 %v2178_v40  ;;  %v2722_v40 = vld [vmem:[#allocation7 + $0x1] ss:$0 sm:$0xff] }
0x1815   :  { %2198 = vrot.lane.b32.xlu1 %v3790_v19, %s3399_s9 }
0x1889   :  { %v2177_v41 = vpop.xlane.xlu0 %2176 }
0x188a   :  { %v2181_v51 = vsub.f32 %v2169_v33, %v2177_v41 }
0x188c   :  { %v2183_v42 = vmul.f32 1.442695, %v2181_v51 }
0x188d   :  { %v2180_v43 = vpop.xlane.xlu1 %2179 }
0x188e   :  { %3189 = vpow2.f32 %v2183_v42  ;;  %v2182_v6 = vsub.f32 %v2172_v37, %v2180_v43 }
0x1890   :  { %v2185_v44 = vmul.f32 1.442695, %v2182_v6  ;;  %v3109_v6 = vld [vmem:[%s3979_s12 + $0x38] sm:$0xff]  }
0x1891   :  { %v2199_v56 = vpop.permute.xlu1 %2198 }
0x1892   :  { %3191 = vpow2.f32 %v2185_v44  ;;  %3030 = vmatpush3.bf16.msra.mxu1 %v2199_v56  ;;  %v3110_v44 = vld [vmem:[%s3979_s12 + $0x30] sm:$0xff]   ;;  %v3111_v56 = vld [vmem:[%s3979_s12 + $0x28] sm:$0xff]  }
0x1893   :  { %3041 = vmatprep.subr.bf16.mxu1 %v3394_v16 }
0x189b   :  { %v3190_v10 = vpop.eup %3189 }
0x189c   :  { %v2187_v45 = vsel %vm401_vm2, %v3190_v10, 0.0 }
0x189d   :  { %2188 = vadd.xlane.f32.xlu0 %v2187_v45  ;;  %v2723_v45 = vld [vmem:[#allocation10 + $0x1] ss:$0 sm:$0xff] }
0x189f   :  { %v3192_v53 = vpop.eup %3191 }
0x18a0   :  { %v2190_v46 = vsel %vm401_vm2, %v3192_v53, 0.0 }
0x18a1   :  { %2191 = vadd.xlane.f32.xlu0 %v2190_v46 }
0x18bb   :  { %v2115_v19 = vpop.f32.mrf.mxu1 }
0x18bc   :  { %v2122_v47 = vadd.f32 %v2115_v19, %v3878_v7 }
0x18bd   :  { %v3021_v48 = vpop.f32.mrf.mxu1 }
0x18bf   :  { %v2118_v49 = vpop.f32.mrf.mxu1 }
0x18c0   :  { %v2123_v52 = vadd.f32 %v2118_v49, %v3881_v11 }
0x18c1   :  { %v3022_v54 = vpop.f32.mrf.mxu1 }
0x1926   :  { %v2189_v55 = vpop.xlane.xlu0 %2188 }
0x1927   :  { %3193 = vrcp.f32 %v2189_v55 }
0x192a   :  { %v2192_v57 = vpop.xlane.xlu0 %2191 }
0x192b   :  { %3195 = vrcp.f32 %v2192_v57 }
0x1934   :  { %v3194_v58 = vpop.eup %3193 }
0x1935   :  { %v2195_v0 = vmul.f32 %v3194_v58, %v3190_v10  ;;  %v3112_v10 = vld [vmem:[%s3979_s12 + $0x20] sm:$0xff]  }
0x1938   :  { %v3196_v59 = vpop.eup %3195 }
0x1939   :  { %v2196_v60 = vmul.f32 %v3196_v59, %v3192_v53 }
0x193b   :  { %v2197_v61 = vpack.c.bf16 %v2196_v60, %v2195_v0 }
0x193d   :  { %3032 = vmatmul.mubr.msk.bf16.vlgmr.msra.gmra.mxu1 %vm401_vm2, %v2197_v61 }
0x193e   :  { %3045 = vmatprep.mubr.msk.bf16.mxu1 %vm3395_vm1, %v3394_v16  ;;  %3042 = vmatpush3.bf16.msra.mxu1 %v3107_v23 }
0x193f   :  { %3043 = vmatprep.subr.bf16.mxu1 %v3394_v16 }
0x1942   :  { %3044 = vmatpush3.bf16.msra.mxu1 %v3108_v24 }
0x19fd   :  { %v2238_v62 = vpop.f32.mrf.mxu1 }
0x19ff   :  { %v3033_v63 = vpop.f32.mrf.mxu1 }
0x1a01   :  { %v2241_v1 = vpop.f32.mrf.mxu1 }
0x1a02   :  { %v2245_v2 = vpack.c.bf16 %v2241_v1, %v2238_v62 }
0x1a03   :  { %v3034_v3 = vpop.f32.mrf.mxu1 }
0x1a04   :  { %3038 = vmatmul.mubr.msk.bf16.vlgmr.msra.gmra.mxu0 %vm401_vm2, %v2245_v2 }
0x1a05   :  { %3057 = vmatprep.mubr.msk.bf16.mxu0 %vm3395_vm1, %v3394_v16  ;;  %3050 = vmatpush3.bf16.msra.mxu0 %v3109_v6 }
0x1a06   :  { %3051 = vmatprep.subr.bf16.mxu0 %v3394_v16 }
0x1a09   :  { %3052 = vmatpush3.bf16.msra.mxu0 %v3110_v44  ;;  %v2744_v44 = vld [vmem:[#allocation11 + $0x1] ss:$0 sm:$0xff] }
0x1a0a   :  { %3053 = vmatprep.subr.bf16.mxu0 %v3394_v16 }
0x1a0d   :  { %3054 = vmatpush3.bf16.msra.mxu0 %v3111_v56 }
0x1a0e   :  { %3055 = vmatprep.subr.bf16.mxu0 %v3394_v16 }
0x1a11   :  { %3056 = vmatpush3.bf16.msra.mxu0 %v3112_v10 }
0x1ac4   :  { %v2292_v4 = vpop.f32.mrf.mxu0 }
0x1ac5   :  { %v3920_v5 = vadd.f32 %v2292_v4, %v2122_v47 }
0x1ac6   :  { %v3039_v7 = vpop.f32.mrf.mxu0 }
0x1ac7   :  { %v2305_v25 = vsel %vm170_vm0, %v3920_v5, 0.0 }
0x1ac8   :  { %2306 = vadd.xlane.f32.xlu0 %v2305_v25  ;;  %v2295_v8 = vpop.f32.mrf.mxu0 }
0x1ac9   :  { %v3924_v9 = vadd.f32 %v2295_v8, %v2123_v52 }
0x1aca   :  { %v3040_v11 = vpop.f32.mrf.mxu0 }
0x1acb   :  { %v2308_v12 = vsel %vm170_vm0, %v3924_v9, 0.0 }
0x1acc   :  { %2309 = vadd.xlane.f32.xlu0 %v2308_v12 }
0x1b51   :  { %v2307_v13 = vpop.xlane.xlu0 %2306 }
0x1b52   :  { %v2311_v14 = vmul.f32 0.03125, %v2307_v13 }
0x1b54   :  { %v2313_v18 = vsub.f32 %v3920_v5, %v2311_v14 }
0x1b55   :  { %v2310_v34 = vpop.xlane.xlu0 %2309 }
0x1b56   :  { %v2312_v15 = vmul.f32 0.03125, %v2310_v34  ;;  %v2315_v38 = vmul.f32 %v2313_v18, %v2313_v18 }
0x1b58   :  { %v2314_v17 = vsub.f32 %v3924_v9, %v2312_v15  ;;  %v2317_v20 = vsel %vm170_vm0, %v2315_v38, 0.0 }
0x1b59   :  { %2318 = vadd.xlane.f32.xlu0 %v2317_v20 }
0x1b5a   :  { %v2316_v21 = vmul.f32 %v2314_v17, %v2314_v17 }
0x1b5c   :  { %v2320_v22 = vsel %vm170_vm0, %v2316_v21, 0.0 }
0x1b5d   :  { %2321 = vadd.xlane.f32.xlu0 %v2320_v22 }
0x1be2   :  { %v2319_v26 = vpop.xlane.xlu0 %2318 }
0x1be3   :  { %v2323_v27 = vmul.f32 0.03125, %v2319_v26 }
0x1be5   :  { %v2325_v28 = vadd.f32 1e-05, %v2323_v27 }
0x1be6   :  { %v2322_v29 = vpop.xlane.xlu0 %2321 }
0x1be7   :  { %3197 = vrsqrt.f32 %v2325_v28  ;;  %v2324_v30 = vmul.f32 0.03125, %v2322_v29 }
0x1be9   :  { %v2326_v31 = vadd.f32 1e-05, %v2324_v30 }
0x1beb   :  { %3199 = vrsqrt.f32 %v2326_v31 }
0x1bf4   :  { %v3198_v33 = vpop.eup %3197 }
0x1bf5   :  { %v2329_v35 = vmul.f32 %v3198_v33, %v2313_v18 }
0x1bf7   :  { %v2337_v39 = vmul.f32 %v2721_v32, %v2329_v35 }
0x1bf8   :  { %v3200_v36 = vpop.eup %3199 }
0x1bf9   :  { %v2330_v37 = vmul.f32 %v3200_v36, %v2314_v17  ;;  %v2345_v51 = vadd.f32 %v2722_v40, %v2337_v39 }
0x1bfb   :  { %v2338_v41 = vmul.f32 %v2721_v32, %v2330_v37 }
0x1bfd   :  { %v2346_v42 = vadd.f32 %v2722_v40, %v2338_v41 }
0x1bff   :  { %v2347_v43 = vpack.c.bf16 %v2346_v42, %v2345_v51 }
0x1c01   :  { %3046 = vmatmul.mubr.msk.bf16.vlgmr.msra.gmra.mxu1 %vm170_vm0, %v2347_v43 }
0x1cc1   :  { %v2410_v53 = vpop.f32.mrf.mxu1 }
0x1cc2   :  { %v2411_v46 = vadd.f32 %v2723_v45, %v2410_v53 }
0x1cc3   :  { %v3047_v19 = vpop.f32.mrf.mxu1 }
0x1cc4   :  { %v2419_v47 = vmul.f32 0.70710677, %v2411_v46  ;;  %v2417_v39 = vmul.f32 0.5, %v2411_v46 }
0x1cc5   :  { %v2413_v48 = vpop.f32.mrf.mxu1 }
0x1cc6   :  { %v2421_v49 = vand.u32 2147483647, %v2419_v47  ;;  %v2414_v52 = vadd.f32 %v2723_v45, %v2413_v48  ;;  %vm2461_vm8 = vcmp.lt.f32.partialorder %v2419_v47, 0.0 }
0x1cc7   :  { %v3048_v54 = vpop.f32.mrf.mxu1 }
0x1cc8   :  { %v2423_v55 = vmul.f32 0.3275911, %v2421_v49  ;;  %v2420_v57 = vmul.f32 0.70710677, %v2414_v52  ;;  %v2449_v60 = vsub.f32 0.0, %v2421_v49  ;;  %v2418_v40 = vmul.f32 0.5, %v2414_v52 }
0x1cca   :  { %v2425_v58 = vadd.f32 1.0, %v2423_v55  ;;  %v2422_v59 = vand.u32 2147483647, %v2420_v57  ;;  %v2451_v61 = vmul.f32 %v2449_v60, %v2421_v49  ;;  %vm2462_vm9 = vcmp.lt.f32.partialorder %v2420_v57, 0.0 }
0x1ccc   :  { %3201 = vrcp.f32 %v2425_v58  ;;  %v2424_v16 = vmul.f32 0.3275911, %v2422_v59  ;;  %v2450_v50 = vsub.f32 0.0, %v2422_v59  ;;  %v2453_v1 = vmul.f32 1.442695, %v2451_v61 }
0x1cce   :  { %v2426_v0 = vadd.f32 1.0, %v2424_v16  ;;  %v2452_v2 = vmul.f32 %v2450_v50, %v2422_v59 }
0x1cd0   :  { %3203 = vrcp.f32 %v2426_v0  ;;  %v2455_v8 = vmul.f32 1.442695, %v2452_v2 }
0x1cd1   :  { %3205 = vpow2.f32 %v2453_v1 }
0x1cd2   :  { %3207 = vpow2.f32 %v2455_v8 }
0x1cd9   :  { %v3202_v62 = vpop.eup %3201 }
0x1cda   :  { %v2431_v63 = vmul.f32 1.0614054, %v3202_v62 }
0x1cdc   :  { %v2727_v3 = vadd.f32 -1.4531521, %v2431_v63 }
0x1cdd   :  { %v3204_v4 = vpop.eup %3203 }
0x1cde   :  { %v2435_v7 = vmul.f32 %v3202_v62, %v2727_v3  ;;  %v2432_v25 = vmul.f32 1.0614054, %v3204_v4  ;;  %v3206_v23 = vpop.eup %3205  ;;  %v2745_v3 = vld [vmem:[%s3981_s14] ss:$0 sm:$0xff] }
0x1cdf   :  { %v3208_v29 = vpop.eup %3207 }
0x1ce0   :  { %v2437_v11 = vadd.f32 1.4214138, %v2435_v7  ;;  %v2728_v12 = vadd.f32 -1.4531521, %v2432_v25  ;;  %v2746_v7 = vld [vmem:[#allocation13] ss:$0 sm:$0xff] }
0x1ce2   :  { %v2439_v13 = vmul.f32 %v3202_v62, %v2437_v11  ;;  %v2436_v14 = vmul.f32 %v3204_v4, %v2728_v12 }
0x1ce4   :  { %v2729_v18 = vadd.f32 -0.28449672, %v2439_v13  ;;  %v2438_v34 = vadd.f32 1.4214138, %v2436_v14 }
0x1ce6   :  { %v2443_v15 = vmul.f32 %v3202_v62, %v2729_v18  ;;  %v2440_v38 = vmul.f32 %v3204_v4, %v2438_v34 }
0x1ce8   :  { %v2445_v17 = vadd.f32 0.2548296, %v2443_v15  ;;  %v2730_v20 = vadd.f32 -0.28449672, %v2440_v38 }
0x1cea   :  { %v2447_v21 = vmul.f32 %v3202_v62, %v2445_v17  ;;  %v2444_v22 = vmul.f32 %v3204_v4, %v2730_v20 }
0x1cec   :  { %v2457_v24 = vmul.f32 %v3206_v23, %v2447_v21  ;;  %v2446_v26 = vadd.f32 0.2548296, %v2444_v22 }
0x1cee   :  { %v2459_v27 = vsub.f32 1.0, %v2457_v24  ;;  %v2448_v28 = vmul.f32 %v3204_v4, %v2446_v26 }
0x1cf0   :  { %v2463_v30 = vsub.f32 0.0, %v2459_v27  ;;  %v2458_v31 = vmul.f32 %v3208_v29, %v2448_v28 }
0x1cf2   :  { %v2465_v33 = vsel %vm2461_vm8, %v2463_v30, %v2459_v27  ;;  %v2460_v35 = vsub.f32 1.0, %v2458_v31 }
0x1cf3   :  { %v2467_v36 = vadd.f32 1.0, %v2465_v33 }
0x1cf4   :  { %v2464_v32 = vsub.f32 0.0, %v2460_v35 }
0x1cf5   :  { %v2469_v51 = vmul.f32 %v2467_v36, %v2417_v39 }
0x1cf6   :  { %v2466_v37 = vsel %vm2462_vm9, %v2464_v32, %v2460_v35 }
0x1cf7   :  { %v2468_v41 = vadd.f32 1.0, %v2466_v37 }
0x1cf9   :  { %v2470_v42 = vmul.f32 %v2468_v41, %v2418_v40 }
0x1cfb   :  { %v2471_v43 = vpack.c.bf16 %v2470_v42, %v2469_v51 }
0x1cfd   :  { %3058 = vmatmul.mubr.msk.bf16.vlgmr.msra.gmra.mxu0 %vm1304_vm7, %v2471_v43 }
0x1dbd   :  { %v2542_v6 = vpop.f32.mrf.mxu0 }
0x1dbe   :  { %v2549_v56 = vadd.f32 %v2542_v6, %v3920_v5 }
0x1dbf   :  { %v3059_v10 = vpop.f32.mrf.mxu0 }
0x1dc0   :  { %v2559_v45 = vadd.f32 %v2744_v44, %v2549_v56 }
0x1dc1   :  { %v2545_v53 = vpop.f32.mrf.mxu0 }
0x1dc2   :  { %v2550_v19 = vadd.f32 %v2545_v53, %v3924_v9  ;;  %v2563_v47 = vsel %vm170_vm0, %v2559_v45, 0.0 }
0x1dc3   :  { %2564 = vadd.xlane.f32.xlu0 %v2563_v47  ;;  %v3060_v46 = vpop.f32.mrf.mxu0 }
0x1dc4   :  { %v2560_v48 = vadd.f32 %v2744_v44, %v2550_v19 }
0x1dc6   :  { %v2566_v49 = vsel %vm170_vm0, %v2560_v48, 0.0 }
0x1dc7   :  { %2567 = vadd.xlane.f32.xlu1 %v2566_v49 }
0x1e4c   :  { %v2565_v52 = vpop.xlane.xlu0 %2564 }
0x1e4d   :  { %v2569_v54 = vmul.f32 0.03125, %v2565_v52 }
0x1e4f   :  { %v2571_v55 = vsub.f32 %v2559_v45, %v2569_v54 }
0x1e50   :  { %v2568_v57 = vpop.xlane.xlu1 %2567 }
0x1e51   :  { %v2570_v58 = vmul.f32 0.03125, %v2568_v57  ;;  %v2573_v59 = vmul.f32 %v2571_v55, %v2571_v55 }
0x1e53   :  { %v2572_v5 = vsub.f32 %v2560_v48, %v2570_v58  ;;  %v2575_v16 = vsel %vm170_vm0, %v2573_v59, 0.0 }
0x1e54   :  { %2576 = vadd.xlane.f32.xlu0 %v2575_v16 }
0x1e55   :  { %v2574_v0 = vmul.f32 %v2572_v5, %v2572_v5 }
0x1e57   :  { %v2578_v9 = vsel %vm170_vm0, %v2574_v0, 0.0 }
0x1e58   :  { %2579 = vadd.xlane.f32.xlu0 %v2578_v9 }
0x1edd   :  { %v2577_v60 = vpop.xlane.xlu0 %2576 }
0x1ede   :  { %v2581_v61 = vmul.f32 0.03125, %v2577_v60 }
0x1ee0   :  { %v2583_v50 = vadd.f32 1e-05, %v2581_v61 }
0x1ee1   :  { %v2580_v62 = vpop.xlane.xlu0 %2579 }
0x1ee2   :  { %3209 = vrsqrt.f32 %v2583_v50  ;;  %v2582_v63 = vmul.f32 0.03125, %v2580_v62 }
0x1ee4   :  { %v2584_v1 = vadd.f32 1e-05, %v2582_v63 }
0x1ee6   :  { %3211 = vrsqrt.f32 %v2584_v1 }
0x1eef   :  { %v3210_v2 = vpop.eup %3209 }
0x1ef0   :  { %v2587_v4 = vmul.f32 %v3210_v2, %v2571_v55 }
0x1ef2   :  { %v2595_v25 = vmul.f32 %v2745_v3, %v2587_v4 }
0x1ef3   :  { %v3212_v8 = vpop.eup %3211 }
0x1ef4   :  { %v2588_v11 = vmul.f32 %v3212_v8, %v2572_v5  ;;  %v2603_v12 = vadd.f32 %v2746_v7, %v2595_v25 }
0x1ef6   :  { %v2596_v13 = vmul.f32 %v2745_v3, %v2588_v11  ;;  %2605 = vst.msk [vmem:[#allocation14] sm:$0xff] %vm170_vm0, %v2603_v12 }
0x1ef8   :  { %v2604_v14 = vadd.f32 %v2746_v7, %v2596_v13 }
0x1efa   :  { %2606 = vst.msk [vmem:[#allocation14 + $0x8] sm:$0xff] %vm170_vm0, %v2604_v14 }
0x1efb   :  { %3364 = shalt.err (!%p3361_p11)
}
0x1efc   :  { %s3401_s14 = smov 128   ;;  %s3402_s3 = smov 8  }
0x1efd   :  { %2618 = dma.vmem_to_hbm [thread:$0]  %s2613_s25, 256, %s3983_s16, [#allocation4], %s3401_s14, %s3401_s14, %s3402_s3  }
0x1efe   :  { %3381 = dma.done.wait [#allocation4], 256  }
0x1eff   :  { %3382 = vsyncadd [#allocation4], 4294967040 }
0x1f00   :  { %2622 = vsyncpa [#allocation3], 1 }
0x1f01   :  { %2623 = vsyncpa [#allocation6], 1 }
0x1f02   :  { %2624 = vsyncpa [#allocation9], 1 }
0x1f03   :  { %2625 = vsyncpa [#allocation12], 1 }
0x1f04   :  { %2626 = vsyncpa [#allocation4], 1 }

</bundles_post_ra>
